<compile_context>
chip_gen: v7x
topology: tpu7x:2x2x1
jax: 0.10.0
libtpu: 0.0.40
codegen_flags: <defaults>
</compile_context>

<pallas_src>
import functools

import jax
import jax.numpy as jnp
from jax.experimental import pallas as pl
from jax.experimental.pallas import tpu as pltpu


# --------------------------------------------------------------------------
# Fused Pallas kernel: whole Predictor forward for one batch element
# --------------------------------------------------------------------------
def _predictor_kernel(
    x_ref, nm_ref, bias_ref, nt_ref,
    in_w_ref, in_b_ref, out_w_ref, out_b_ref, lnf_g_ref, lnf_b_ref,
    ln1_g_ref, ln1_b_ref, wqkv_ref, bqkv_ref, wo_ref, bo_ref,
    ln2_g_ref, ln2_b_ref, w1_ref, b1_ref, w2_ref, b2_ref,
    o_ref, *, num_layers, num_heads,
):
    f32 = jnp.float32
    bf16 = jnp.bfloat16
    L = x_ref.shape[1]
    dim = in_w_ref.shape[1]
    S = nt_ref.shape[0]
    Dh = dim // num_heads
    scale = 1.0 / (Dh ** 0.5)

    def mm(a, b):
        # bf16 MXU inputs, f32 accumulation.  Weights arrive as bf16 already;
        # the cast is a no-op for them and only touches the activation side.
        return jnp.dot(a.astype(bf16), b.astype(bf16), preferred_element_type=f32)

    def mm_t(a, b):
        # a @ b.T without materializing the transpose (contract last dims).
        return jax.lax.dot_general(
            a.astype(bf16), b.astype(bf16),
            dimension_numbers=(((1,), (1,)), ((), ())),
            preferred_element_type=f32)

    def layernorm(z, g, b, eps=1e-5):
        mu = jnp.mean(z, axis=-1, keepdims=True)
        var = jnp.mean(jnp.square(z - mu), axis=-1, keepdims=True)
        return (z - mu) * jax.lax.rsqrt(var + eps) * g + b

    # ---- input projection ----------------------------------------------------
    x = mm(x_ref[0], in_w_ref[...]) + in_b_ref[...]            # (L, dim) f32

    # ---- null-token scatter --------------------------------------------------
    # The j-th hidden (null-masked) constituent of this jet gets null_token[j]
    # (same flattened-assignment order as the PyTorch boolean-index write).
    nm = nm_ref[0]                                             # (L, 1) in {0, 1}
    row = jax.lax.broadcasted_iota(jnp.int32, (L, L), 0)
    col = jax.lax.broadcasted_iota(jnp.int32, (L, L), 1)
    tri = (col <= row).astype(f32)
    counts = mm(tri, nm)                                       # inclusive cumsum (exact)
    idx = counts - 1.0                                         # (L, 1)
    col_s = jax.lax.broadcasted_iota(jnp.int32, (L, S), 1).astype(f32)
    onehot = (jnp.abs(idx - col_s) < 0.5).astype(f32)          # (L, S)
    gathered = mm(onehot, nt_ref[...])                         # (L, dim) exact one-hot gather
    x = jnp.where(nm > 0.5, gathered, x)

    attn_bias = bias_ref[0]                                    # (1, L); -1e9 on padding keys

    # ---- pre-LN transformer encoder (unrolled; weights resident in VMEM) ----
    for l in range(num_layers):
        # Multi-head self-attention with key-padding mask.
        h = layernorm(x, ln1_g_ref[l], ln1_b_ref[l])
        qkv = mm(h, wqkv_ref[l]) + bqkv_ref[l]                 # (L, 3*dim) f32
        wo_l = wo_ref[l]                                       # (dim, dim) bf16
        attn = jnp.zeros((L, dim), f32)
        for hd in range(num_heads):
            q = qkv[:, hd * Dh:(hd + 1) * Dh] * scale          # (L, Dh)
            k = qkv[:, dim + hd * Dh:dim + (hd + 1) * Dh]      # (L, Dh)
            v = qkv[:, 2 * dim + hd * Dh:2 * dim + (hd + 1) * Dh]
            s = mm_t(q, k) + attn_bias                         # (L, L) f32
            s = s - jnp.max(s, axis=-1, keepdims=True)
            p = jnp.exp(s)
            p = p * pl.reciprocal(jnp.sum(p, axis=-1, keepdims=True), approx=True)
            o = mm(p, v)                                       # (L, Dh)
            # Fold the per-head slice of the output projection in here: keeps
            # the attention contribution lane-dense (L, dim), no head concat.
            attn = attn + mm(o, wo_l[hd * Dh:(hd + 1) * Dh, :])
        x = x + attn + bo_ref[l]                               # fused residual + bias

        # MLP block.
        h = layernorm(x, ln2_g_ref[l], ln2_b_ref[l])
        ff = jax.nn.gelu(mm(h, w1_ref[l]) + b1_ref[l], approximate=True)
        x = x + mm(ff, w2_ref[l]) + b2_ref[l]                  # fused residual + bias

    # ---- final LN + output projection ----------------------------------------
    x = layernorm(x, lnf_g_ref[...], lnf_b_ref[...])
    o_ref[0] = (mm(x, out_w_ref[...]) + out_b_ref[...]).astype(o_ref.dtype)


# --------------------------------------------------------------------------
# Wrapper
# --------------------------------------------------------------------------
def _full_spec(shape):
    zeros = (0,) * len(shape)
    return pl.BlockSpec(tuple(shape), lambda b, _z=zeros: _z)


def _batch_spec(shape):
    zeros = (0,) * (len(shape) - 1)
    return pl.BlockSpec((1,) + tuple(shape[1:]), lambda b, _z=zeros: (b,) + _z)


@functools.partial(jax.jit, static_argnums=(4,))
def predictor_forward(params, x_in, mask, null_mask, num_heads):
    """Fused Predictor forward: one pallas_call, grid over the batch."""
    f32 = jnp.float32
    bf16 = jnp.bfloat16
    B, L, inpt_dim = x_in.shape
    S = null_mask.shape[1]
    R = L - S
    layers = params["layers"]
    NL = len(layers)

    # Null mask aligned to the full sequence (registers / cls are never null).
    nm_full = jnp.concatenate(
        [jnp.zeros((B, R, 1), f32), null_mask.astype(f32)[..., None]], axis=1)
    # Additive key-padding bias, computed once for all layers.
    bias = ((1.0 - mask.astype(f32)) * (-1e9))[:, None, :]      # (B, 1, L)
    nt = params["null_token"][:S].astype(f32)                   # (S, dim)

    def stack_w(name):  # 2-D per-layer weight matrices -> (NL, K, N) bf16
        return jnp.stack([lay[name] for lay in layers], axis=0).astype(bf16)

    def stack_v(name):  # 1-D per-layer vectors (LN / biases) -> (NL, 1, N) f32
        return jnp.stack([lay[name] for lay in layers], axis=0).astype(f32)[:, None, :]

    inputs = [
        x_in.astype(f32), nm_full, bias, nt,
        params["in_w"].astype(bf16), params["in_b"].astype(f32)[None, :],
        params["out_w"].astype(bf16), params["out_b"].astype(f32)[None, :],
        params["lnf_g"].astype(f32)[None, :], params["lnf_b"].astype(f32)[None, :],
        stack_v("ln1_g"), stack_v("ln1_b"),
        stack_w("wqkv"), stack_v("bqkv"),
        stack_w("wo"), stack_v("bo"),
        stack_v("ln2_g"), stack_v("ln2_b"),
        stack_w("w1"), stack_v("b1"),
        stack_w("w2"), stack_v("b2"),
    ]
    in_specs = [_batch_spec(inputs[0].shape), _batch_spec(inputs[1].shape),
                _batch_spec(inputs[2].shape)]
    in_specs += [_full_spec(a.shape) for a in inputs[3:]]

    return pl.pallas_call(
        functools.partial(_predictor_kernel, num_layers=NL, num_heads=num_heads),
        out_shape=jax.ShapeDtypeStruct((B, L, inpt_dim), x_in.dtype),
        grid=(B,),
        in_specs=in_specs,
        out_specs=pl.BlockSpec((1, L, inpt_dim), lambda b: (b, 0, 0)),
        compiler_params=pltpu.CompilerParams(dimension_semantics=("parallel",)),
    )(*inputs)


# --------------------------------------------------------------------------
# Pure-JAX reference
# --------------------------------------------------------------------------
def _ln_ref(x, g, b, eps=1e-5):
    mu = jnp.mean(x, axis=-1, keepdims=True)
    var = jnp.mean(jnp.square(x - mu), axis=-1, keepdims=True)
    return (x - mu) * jax.lax.rsqrt(var + eps) * g + b


def reference_forward(params, x_in, mask, null_mask, num_heads):
    dim = params["in_w"].shape[1]
    x = x_in @ params["in_w"] + params["in_b"]
    B, S = null_mask.shape
    L = x.shape[1]
    counts = jnp.cumsum(null_mask.astype(jnp.int32), axis=1)
    idx = jnp.clip(counts - 1, 0, S - 1)
    gathered = params["null_token"][:S][idx]                    # (B, S, dim)
    tail = jnp.where(null_mask[..., None], gathered, x[:, L - S:, :])
    x = jnp.concatenate([x[:, :L - S, :], tail], axis=1)

    H = num_heads
    Dh = dim // H
    mask_f = mask.astype(x.dtype)
    for layer in params["layers"]:
        h = _ln_ref(x, layer["ln1_g"], layer["ln1_b"])
        qkv = h @ layer["wqkv"] + layer["bqkv"]
        qkv = qkv.reshape(B, L, 3, H, Dh).transpose(2, 0, 3, 1, 4)
        q, k, v = qkv[0], qkv[1], qkv[2]
        s = jnp.einsum("bhqd,bhkd->bhqk", q, k) / (Dh ** 0.5)
        s = s + (1.0 - mask_f)[:, None, None, :] * (-1e9)
        p = jax.nn.softmax(s, axis=-1)
        a = jnp.einsum("bhqk,bhkd->bhqd", p, v).transpose(0, 2, 1, 3).reshape(B, L, dim)
        x = x + a @ layer["wo"] + layer["bo"]
        h = _ln_ref(x, layer["ln2_g"], layer["ln2_b"])
        x = x + jax.nn.gelu(h @ layer["w1"] + layer["b1"], approximate=True) @ layer["w2"] + layer["b2"]
    x = _ln_ref(x, params["lnf_g"], params["lnf_b"])
    return x @ params["out_w"] + params["out_b"]


# --------------------------------------------------------------------------
# Deterministic parameter init (synthetic, no checkpoint)
# --------------------------------------------------------------------------
def init_params(key, *, inpt_dim, dim, ff_dim, num_layers, num_csts):
    def nxt():
        nonlocal key
        key, sub = jax.random.split(key)
        return sub

    def w(shape, scale=0.02):
        return (scale * jax.random.normal(nxt(), shape)).astype(jnp.float32)

    params = {
        "in_w": w((inpt_dim, dim)), "in_b": jnp.zeros((dim,), jnp.float32),
        "out_w": w((dim, inpt_dim)), "out_b": jnp.zeros((inpt_dim,), jnp.float32),
        "null_token": w((num_csts, dim), scale=0.001),
        "lnf_g": jnp.ones((dim,), jnp.float32), "lnf_b": jnp.zeros((dim,), jnp.float32),
        "layers": [],
    }
    for _ in range(num_layers):
        params["layers"].append({
            "ln1_g": jnp.ones((dim,), jnp.float32), "ln1_b": jnp.zeros((dim,), jnp.float32),
            "wqkv": w((dim, 3 * dim)), "bqkv": jnp.zeros((3 * dim,), jnp.float32),
            "wo": w((dim, dim)), "bo": jnp.zeros((dim,), jnp.float32),
            "ln2_g": jnp.ones((dim,), jnp.float32), "ln2_b": jnp.zeros((dim,), jnp.float32),
            "w1": w((dim, ff_dim)), "b1": jnp.zeros((ff_dim,), jnp.float32),
            "w2": w((ff_dim, dim)), "b2": jnp.zeros((dim,), jnp.float32),
        })
    return params


# --------------------------------------------------------------------------
if __name__ == "__main__":
    B, S, R = 2, 8, 2          # batch, constituents, registers/cls tokens
    L = S + R                  # total sequence length seen by the predictor
    inpt_dim, dim = 16, 32     # student embedding dim, predictor hidden dim
    num_heads, ff_dim, num_layers, num_csts = 4, 64, 2, 12

    key = jax.random.PRNGKey(0)
    kx, kn, kp = jax.random.split(key, 3)

    x_in = jax.random.normal(kx, (B, L, inpt_dim), dtype=jnp.float32)
    real_counts = jnp.array([6, 4], dtype=jnp.int32)                        # real csts per jet
    cst_mask = jnp.arange(S)[None, :] < real_counts[:, None]                # (B, S)
    mask = jnp.concatenate([jnp.ones((B, R), bool), cst_mask], axis=1)      # (B, L)
    null_mask = cst_mask & (jax.random.uniform(kn, (B, S)) < 0.5)           # hidden csts

    params = init_params(kp, inpt_dim=inpt_dim, dim=dim, ff_dim=ff_dim,
                         num_layers=num_layers, num_csts=num_csts)

    out = predictor_forward(params, x_in, mask, null_mask, num_heads)
    out = jax.block_until_ready(out)

    with jax.default_matmul_precision("float32"):
        ref = reference_forward(params, x_in, mask, null_mask, num_heads)
    err = float(jnp.max(jnp.abs(out - ref)))

    assert out.shape == (B, L, inpt_dim), out.shape
    assert bool(jnp.all(jnp.isfinite(out)))
    assert err < 2e-2, f"mismatch vs reference: {err}"
    print("KERNEL_OK")
</pallas_src>

<mosaic_0001>
module attributes {stable_mosaic.version = 11 : i64} {
  func.func @_predictor_kernel(%arg0: i32, %arg1: memref<1x10x16xf32, #tpu.memory_space<vmem>>, %arg2: memref<1x10x1xf32, #tpu.memory_space<vmem>>, %arg3: memref<1x1x10xf32, #tpu.memory_space<vmem>>, %arg4: memref<8x32xf32, #tpu.memory_space<vmem>>, %arg5: memref<16x32xbf16, #tpu.memory_space<vmem>>, %arg6: memref<1x32xf32, #tpu.memory_space<vmem>>, %arg7: memref<32x16xbf16, #tpu.memory_space<vmem>>, %arg8: memref<1x16xf32, #tpu.memory_space<vmem>>, %arg9: memref<1x32xf32, #tpu.memory_space<vmem>>, %arg10: memref<1x32xf32, #tpu.memory_space<vmem>>, %arg11: memref<2x1x32xf32, #tpu.memory_space<vmem>>, %arg12: memref<2x1x32xf32, #tpu.memory_space<vmem>>, %arg13: memref<2x32x96xbf16, #tpu.memory_space<vmem>>, %arg14: memref<2x1x96xf32, #tpu.memory_space<vmem>>, %arg15: memref<2x32x32xbf16, #tpu.memory_space<vmem>>, %arg16: memref<2x1x32xf32, #tpu.memory_space<vmem>>, %arg17: memref<2x1x32xf32, #tpu.memory_space<vmem>>, %arg18: memref<2x1x32xf32, #tpu.memory_space<vmem>>, %arg19: memref<2x32x64xbf16, #tpu.memory_space<vmem>>, %arg20: memref<2x1x64xf32, #tpu.memory_space<vmem>>, %arg21: memref<2x64x32xbf16, #tpu.memory_space<vmem>>, %arg22: memref<2x1x32xf32, #tpu.memory_space<vmem>>, %arg23: memref<1x10x16xf32, #tpu.memory_space<vmem>>) attributes {dimension_semantics = [#tpu.dimension_semantics<parallel>], iteration_bounds = array<i64: 2>, scalar_prefetch = 0 : i64, scratch_operands = 0 : i64, tpu.core_type = #tpu.core_type<tc>, window_params = [{transform_indices = @transform_0, window_bounds = array<i64: 1, 10, 16>}, {transform_indices = @transform_1, window_bounds = array<i64: 1, 10, 1>}, {transform_indices = @transform_2, window_bounds = array<i64: 1, 1, 10>}, {pipeline_mode = #tpu.pipeline_mode<synchronous>, transform_indices = @transform_3, window_bounds = array<i64: 8, 32>}, {pipeline_mode = #tpu.pipeline_mode<synchronous>, transform_indices = @transform_4, window_bounds = array<i64: 16, 32>}, {pipeline_mode = #tpu.pipeline_mode<synchronous>, transform_indices = @transform_5, window_bounds = array<i64: 1, 32>}, {pipeline_mode = #tpu.pipeline_mode<synchronous>, transform_indices = @transform_6, window_bounds = array<i64: 32, 16>}, {pipeline_mode = #tpu.pipeline_mode<synchronous>, transform_indices = @transform_7, window_bounds = array<i64: 1, 16>}, {pipeline_mode = #tpu.pipeline_mode<synchronous>, transform_indices = @transform_8, window_bounds = array<i64: 1, 32>}, {pipeline_mode = #tpu.pipeline_mode<synchronous>, transform_indices = @transform_9, window_bounds = array<i64: 1, 32>}, {pipeline_mode = #tpu.pipeline_mode<synchronous>, transform_indices = @transform_10, window_bounds = array<i64: 2, 1, 32>}, {pipeline_mode = #tpu.pipeline_mode<synchronous>, transform_indices = @transform_11, window_bounds = array<i64: 2, 1, 32>}, {pipeline_mode = #tpu.pipeline_mode<synchronous>, transform_indices = @transform_12, window_bounds = array<i64: 2, 32, 96>}, {pipeline_mode = #tpu.pipeline_mode<synchronous>, transform_indices = @transform_13, window_bounds = array<i64: 2, 1, 96>}, {pipeline_mode = #tpu.pipeline_mode<synchronous>, transform_indices = @transform_14, window_bounds = array<i64: 2, 32, 32>}, {pipeline_mode = #tpu.pipeline_mode<synchronous>, transform_indices = @transform_15, window_bounds = array<i64: 2, 1, 32>}, {pipeline_mode = #tpu.pipeline_mode<synchronous>, transform_indices = @transform_16, window_bounds = array<i64: 2, 1, 32>}, {pipeline_mode = #tpu.pipeline_mode<synchronous>, transform_indices = @transform_17, window_bounds = array<i64: 2, 1, 32>}, {pipeline_mode = #tpu.pipeline_mode<synchronous>, transform_indices = @transform_18, window_bounds = array<i64: 2, 32, 64>}, {pipeline_mode = #tpu.pipeline_mode<synchronous>, transform_indices = @transform_19, window_bounds = array<i64: 2, 1, 64>}, {pipeline_mode = #tpu.pipeline_mode<synchronous>, transform_indices = @transform_20, window_bounds = array<i64: 2, 64, 32>}, {pipeline_mode = #tpu.pipeline_mode<synchronous>, transform_indices = @transform_21, window_bounds = array<i64: 2, 1, 32>}, {transform_indices = @transform_22, window_bounds = array<i64: 1, 10, 16>}]} {
    %c0 = arith.constant 0 : index
    %c0_0 = arith.constant 0 : index
    %c0_1 = arith.constant 0 : index
    %0 = vector.load %arg1[%c0, %c0_0, %c0_1] : memref<1x10x16xf32, #tpu.memory_space<vmem>>, vector<1x10x16xf32>
    %1 = vector.shape_cast %0 : vector<1x10x16xf32> to vector<10x16xf32>
    %c0_2 = arith.constant 0 : index
    %c0_3 = arith.constant 0 : index
    %2 = vector.load %arg5[%c0_2, %c0_3] : memref<16x32xbf16, #tpu.memory_space<vmem>>, vector<16x32xbf16>
    %3 = arith.truncf %1 : vector<10x16xf32> to vector<10x16xbf16>
    %cst = arith.constant dense<0.000000e+00> : vector<10x32xf32>
    %4 = tpu.matmul %3, %2, %cst {dimension_numbers = #tpu.dot_dimension_numbers<[1], [0], [0], [1], [0, 0, 1, 1], [], []>} : vector<10x16xbf16>, vector<16x32xbf16>, vector<10x32xf32> -> vector<10x32xf32>
    %c0_4 = arith.constant 0 : index
    %c0_5 = arith.constant 0 : index
    %5 = vector.load %arg6[%c0_4, %c0_5] : memref<1x32xf32, #tpu.memory_space<vmem>>, vector<1x32xf32>
    %6 = vector.broadcast %5 : vector<1x32xf32> to vector<10x32xf32>
    %7 = arith.addf %4, %6 : vector<10x32xf32>
    %c0_6 = arith.constant 0 : index
    %c0_7 = arith.constant 0 : index
    %c0_8 = arith.constant 0 : index
    %8 = vector.load %arg2[%c0_6, %c0_7, %c0_8] : memref<1x10x1xf32, #tpu.memory_space<vmem>>, vector<1x10x1xf32>
    %9 = vector.shape_cast %8 : vector<1x10x1xf32> to vector<10x1xf32>
    %10 = tpu.iota {dimensions = array<i32: 0>} : vector<10x10xi32>
    %11 = tpu.iota {dimensions = array<i32: 1>} : vector<10x10xi32>
    %12 = arith.cmpi sle, %11, %10 : vector<10x10xi32>
    %13 = arith.extui %12 : vector<10x10xi1> to vector<10x10xi32>
    %14 = arith.sitofp %13 : vector<10x10xi32> to vector<10x10xf32>
    %15 = arith.truncf %14 : vector<10x10xf32> to vector<10x10xbf16>
    %16 = arith.truncf %9 : vector<10x1xf32> to vector<10x1xbf16>
    %cst_9 = arith.constant dense<0.000000e+00> : vector<10x1xf32>
    %17 = tpu.matmul %15, %16, %cst_9 {dimension_numbers = #tpu.dot_dimension_numbers<[1], [0], [0], [1], [0, 0, 1, 1], [], []>} : vector<10x10xbf16>, vector<10x1xbf16>, vector<10x1xf32> -> vector<10x1xf32>
    %cst_10 = arith.constant 1.000000e+00 : f32
    %18 = vector.broadcast %cst_10 : f32 to vector<10x1xf32>
    %19 = arith.subf %17, %18 : vector<10x1xf32>
    %20 = tpu.iota {dimensions = array<i32: 1>} : vector<10x8xi32>
    %21 = arith.sitofp %20 : vector<10x8xi32> to vector<10x8xf32>
    %22 = vector.broadcast %19 : vector<10x1xf32> to vector<10x8xf32>
    %23 = arith.subf %22, %21 : vector<10x8xf32>
    %24 = math.absf %23 : vector<10x8xf32>
    %cst_11 = arith.constant 5.000000e-01 : f32
    %25 = vector.broadcast %cst_11 : f32 to vector<10x8xf32>
    %26 = arith.cmpf olt, %24, %25 : vector<10x8xf32>
    %27 = arith.extui %26 : vector<10x8xi1> to vector<10x8xi32>
    %28 = arith.sitofp %27 : vector<10x8xi32> to vector<10x8xf32>
    %c0_12 = arith.constant 0 : index
    %c0_13 = arith.constant 0 : index
    %29 = vector.load %arg4[%c0_12, %c0_13] : memref<8x32xf32, #tpu.memory_space<vmem>>, vector<8x32xf32>
    %30 = arith.truncf %28 : vector<10x8xf32> to vector<10x8xbf16>
    %31 = arith.truncf %29 : vector<8x32xf32> to vector<8x32xbf16>
    %cst_14 = arith.constant dense<0.000000e+00> : vector<10x32xf32>
    %32 = tpu.matmul %30, %31, %cst_14 {dimension_numbers = #tpu.dot_dimension_numbers<[1], [0], [0], [1], [0, 0, 1, 1], [], []>} : vector<10x8xbf16>, vector<8x32xbf16>, vector<10x32xf32> -> vector<10x32xf32>
    %cst_15 = arith.constant 5.000000e-01 : f32
    %33 = vector.broadcast %cst_15 : f32 to vector<10x1xf32>
    %34 = arith.cmpf ogt, %9, %33 : vector<10x1xf32>
    %35 = vector.shape_cast %34 : vector<10x1xi1> to vector<10x1xi1>
    %36 = vector.broadcast %35 : vector<10x1xi1> to vector<10x32xi1>
    %37 = arith.select %36, %32, %7 : vector<10x32xi1>, vector<10x32xf32>
    %c0_16 = arith.constant 0 : index
    %c0_17 = arith.constant 0 : index
    %c0_18 = arith.constant 0 : index
    %38 = vector.load %arg3[%c0_16, %c0_17, %c0_18] : memref<1x1x10xf32, #tpu.memory_space<vmem>>, vector<1x1x10xf32>
    %39 = vector.shape_cast %38 : vector<1x1x10xf32> to vector<1x10xf32>
    %c0_19 = arith.constant 0 : index
    %c0_20 = arith.constant 0 : index
    %c0_21 = arith.constant 0 : index
    %40 = vector.load %arg11[%c0_19, %c0_20, %c0_21] : memref<2x1x32xf32, #tpu.memory_space<vmem>>, vector<1x1x32xf32>
    %41 = vector.shape_cast %40 : vector<1x1x32xf32> to vector<1x32xf32>
    %c0_22 = arith.constant 0 : index
    %c0_23 = arith.constant 0 : index
    %c0_24 = arith.constant 0 : index
    %42 = vector.load %arg12[%c0_22, %c0_23, %c0_24] : memref<2x1x32xf32, #tpu.memory_space<vmem>>, vector<1x1x32xf32>
    %43 = vector.shape_cast %42 : vector<1x1x32xf32> to vector<1x32xf32>
    %cst_25 = arith.constant dense<0.000000e+00> : vector<10xf32>
    %44 = vector.multi_reduction <add>, %37, %cst_25 [1] : vector<10x32xf32> to vector<10xf32>
    %45 = vector.shape_cast %44 : vector<10xf32> to vector<10x1xf32>
    %cst_26 = arith.constant 3.200000e+01 : f32
    %46 = vector.broadcast %cst_26 : f32 to vector<10x1xf32>
    %47 = arith.divf %45, %46 : vector<10x1xf32>
    %48 = vector.broadcast %47 : vector<10x1xf32> to vector<10x32xf32>
    %49 = arith.subf %37, %48 : vector<10x32xf32>
    %50 = arith.mulf %49, %49 : vector<10x32xf32>
    %cst_27 = arith.constant dense<0.000000e+00> : vector<10xf32>
    %51 = vector.multi_reduction <add>, %50, %cst_27 [1] : vector<10x32xf32> to vector<10xf32>
    %52 = vector.shape_cast %51 : vector<10xf32> to vector<10x1xf32>
    %cst_28 = arith.constant 3.200000e+01 : f32
    %53 = vector.broadcast %cst_28 : f32 to vector<10x1xf32>
    %54 = arith.divf %52, %53 : vector<10x1xf32>
    %55 = vector.broadcast %47 : vector<10x1xf32> to vector<10x32xf32>
    %56 = arith.subf %37, %55 : vector<10x32xf32>
    %cst_29 = arith.constant 9.99999974E-6 : f32
    %57 = vector.broadcast %cst_29 : f32 to vector<10x1xf32>
    %58 = arith.addf %54, %57 : vector<10x1xf32>
    %59 = math.rsqrt %58 : vector<10x1xf32>
    %60 = vector.broadcast %59 : vector<10x1xf32> to vector<10x32xf32>
    %61 = arith.mulf %56, %60 : vector<10x32xf32>
    %62 = vector.broadcast %41 : vector<1x32xf32> to vector<10x32xf32>
    %63 = arith.mulf %61, %62 : vector<10x32xf32>
    %64 = vector.broadcast %43 : vector<1x32xf32> to vector<10x32xf32>
    %65 = arith.addf %63, %64 : vector<10x32xf32>
    %c0_30 = arith.constant 0 : index
    %c0_31 = arith.constant 0 : index
    %c0_32 = arith.constant 0 : index
    %66 = vector.load %arg13[%c0_30, %c0_31, %c0_32] : memref<2x32x96xbf16, #tpu.memory_space<vmem>>, vector<1x32x96xbf16>
    %67 = vector.shape_cast %66 : vector<1x32x96xbf16> to vector<32x96xbf16>
    %68 = arith.truncf %65 : vector<10x32xf32> to vector<10x32xbf16>
    %cst_33 = arith.constant dense<0.000000e+00> : vector<10x96xf32>
    %69 = tpu.matmul %68, %67, %cst_33 {dimension_numbers = #tpu.dot_dimension_numbers<[1], [0], [0], [1], [0, 0, 1, 1], [], []>} : vector<10x32xbf16>, vector<32x96xbf16>, vector<10x96xf32> -> vector<10x96xf32>
    %c0_34 = arith.constant 0 : index
    %c0_35 = arith.constant 0 : index
    %c0_36 = arith.constant 0 : index
    %70 = vector.load %arg14[%c0_34, %c0_35, %c0_36] : memref<2x1x96xf32, #tpu.memory_space<vmem>>, vector<1x1x96xf32>
    %71 = vector.shape_cast %70 : vector<1x1x96xf32> to vector<1x96xf32>
    %72 = vector.broadcast %71 : vector<1x96xf32> to vector<10x96xf32>
    %73 = arith.addf %69, %72 : vector<10x96xf32>
    %c0_37 = arith.constant 0 : index
    %c0_38 = arith.constant 0 : index
    %c0_39 = arith.constant 0 : index
    %74 = vector.load %arg15[%c0_37, %c0_38, %c0_39] : memref<2x32x32xbf16, #tpu.memory_space<vmem>>, vector<1x32x32xbf16>
    %75 = vector.shape_cast %74 : vector<1x32x32xbf16> to vector<32x32xbf16>
    %cst_40 = arith.constant 0.000000e+00 : f32
    %76 = vector.broadcast %cst_40 : f32 to vector<10x32xf32>
    %77 = vector.extract_strided_slice %73 {offsets = [0, 0], sizes = [10, 8], strides = [1, 1]} : vector<10x96xf32> to vector<10x8xf32>
    %cst_41 = arith.constant 0.353553385 : f32
    %78 = vector.broadcast %cst_41 : f32 to vector<10x8xf32>
    %79 = arith.mulf %77, %78 : vector<10x8xf32>
    %80 = vector.extract_strided_slice %73 {offsets = [0, 32], sizes = [10, 8], strides = [1, 1]} : vector<10x96xf32> to vector<10x8xf32>
    %81 = vector.extract_strided_slice %73 {offsets = [0, 64], sizes = [10, 8], strides = [1, 1]} : vector<10x96xf32> to vector<10x8xf32>
    %82 = arith.truncf %79 : vector<10x8xf32> to vector<10x8xbf16>
    %83 = arith.truncf %80 : vector<10x8xf32> to vector<10x8xbf16>
    %cst_42 = arith.constant dense<0.000000e+00> : vector<10x10xf32>
    %84 = tpu.matmul %82, %83, %cst_42 {dimension_numbers = #tpu.dot_dimension_numbers<[1], [1], [0], [0], [0, 0, 1, 0], [], []>} : vector<10x8xbf16>, vector<10x8xbf16>, vector<10x10xf32> -> vector<10x10xf32>
    %85 = vector.broadcast %39 : vector<1x10xf32> to vector<10x10xf32>
    %86 = arith.addf %84, %85 : vector<10x10xf32>
    %cst_43 = arith.constant dense<0xFF800000> : vector<10xf32>
    %87 = vector.multi_reduction <maximumf>, %86, %cst_43 [1] : vector<10x10xf32> to vector<10xf32>
    %88 = vector.shape_cast %87 : vector<10xf32> to vector<10x1xf32>
    %89 = vector.broadcast %88 : vector<10x1xf32> to vector<10x10xf32>
    %90 = arith.subf %86, %89 : vector<10x10xf32>
    %91 = math.exp %90 : vector<10x10xf32>
    %cst_44 = arith.constant dense<0.000000e+00> : vector<10xf32>
    %92 = vector.multi_reduction <add>, %91, %cst_44 [1] : vector<10x10xf32> to vector<10xf32>
    %93 = vector.shape_cast %92 : vector<10xf32> to vector<10x1xf32>
    %94 = tpu.reciprocal %93 {approx = true} : vector<10x1xf32> -> vector<10x1xf32>
    %95 = vector.broadcast %94 : vector<10x1xf32> to vector<10x10xf32>
    %96 = arith.mulf %91, %95 : vector<10x10xf32>
    %97 = arith.truncf %96 : vector<10x10xf32> to vector<10x10xbf16>
    %98 = arith.truncf %81 : vector<10x8xf32> to vector<10x8xbf16>
    %cst_45 = arith.constant dense<0.000000e+00> : vector<10x8xf32>
    %99 = tpu.matmul %97, %98, %cst_45 {dimension_numbers = #tpu.dot_dimension_numbers<[1], [0], [0], [1], [0, 0, 1, 1], [], []>} : vector<10x10xbf16>, vector<10x8xbf16>, vector<10x8xf32> -> vector<10x8xf32>
    %100 = vector.extract_strided_slice %75 {offsets = [0, 0], sizes = [8, 32], strides = [1, 1]} : vector<32x32xbf16> to vector<8x32xbf16>
    %101 = arith.truncf %99 : vector<10x8xf32> to vector<10x8xbf16>
    %cst_46 = arith.constant dense<0.000000e+00> : vector<10x32xf32>
    %102 = tpu.matmul %101, %100, %cst_46 {dimension_numbers = #tpu.dot_dimension_numbers<[1], [0], [0], [1], [0, 0, 1, 1], [], []>} : vector<10x8xbf16>, vector<8x32xbf16>, vector<10x32xf32> -> vector<10x32xf32>
    %103 = arith.addf %76, %102 : vector<10x32xf32>
    %104 = vector.extract_strided_slice %73 {offsets = [0, 8], sizes = [10, 8], strides = [1, 1]} : vector<10x96xf32> to vector<10x8xf32>
    %cst_47 = arith.constant 0.353553385 : f32
    %105 = vector.broadcast %cst_47 : f32 to vector<10x8xf32>
    %106 = arith.mulf %104, %105 : vector<10x8xf32>
    %107 = vector.extract_strided_slice %73 {offsets = [0, 40], sizes = [10, 8], strides = [1, 1]} : vector<10x96xf32> to vector<10x8xf32>
    %108 = vector.extract_strided_slice %73 {offsets = [0, 72], sizes = [10, 8], strides = [1, 1]} : vector<10x96xf32> to vector<10x8xf32>
    %109 = arith.truncf %106 : vector<10x8xf32> to vector<10x8xbf16>
    %110 = arith.truncf %107 : vector<10x8xf32> to vector<10x8xbf16>
    %cst_48 = arith.constant dense<0.000000e+00> : vector<10x10xf32>
    %111 = tpu.matmul %109, %110, %cst_48 {dimension_numbers = #tpu.dot_dimension_numbers<[1], [1], [0], [0], [0, 0, 1, 0], [], []>} : vector<10x8xbf16>, vector<10x8xbf16>, vector<10x10xf32> -> vector<10x10xf32>
    %112 = vector.broadcast %39 : vector<1x10xf32> to vector<10x10xf32>
    %113 = arith.addf %111, %112 : vector<10x10xf32>
    %cst_49 = arith.constant dense<0xFF800000> : vector<10xf32>
    %114 = vector.multi_reduction <maximumf>, %113, %cst_49 [1] : vector<10x10xf32> to vector<10xf32>
    %115 = vector.shape_cast %114 : vector<10xf32> to vector<10x1xf32>
    %116 = vector.broadcast %115 : vector<10x1xf32> to vector<10x10xf32>
    %117 = arith.subf %113, %116 : vector<10x10xf32>
    %118 = math.exp %117 : vector<10x10xf32>
    %cst_50 = arith.constant dense<0.000000e+00> : vector<10xf32>
    %119 = vector.multi_reduction <add>, %118, %cst_50 [1] : vector<10x10xf32> to vector<10xf32>
    %120 = vector.shape_cast %119 : vector<10xf32> to vector<10x1xf32>
    %121 = tpu.reciprocal %120 {approx = true} : vector<10x1xf32> -> vector<10x1xf32>
    %122 = vector.broadcast %121 : vector<10x1xf32> to vector<10x10xf32>
    %123 = arith.mulf %118, %122 : vector<10x10xf32>
    %124 = arith.truncf %123 : vector<10x10xf32> to vector<10x10xbf16>
    %125 = arith.truncf %108 : vector<10x8xf32> to vector<10x8xbf16>
    %cst_51 = arith.constant dense<0.000000e+00> : vector<10x8xf32>
    %126 = tpu.matmul %124, %125, %cst_51 {dimension_numbers = #tpu.dot_dimension_numbers<[1], [0], [0], [1], [0, 0, 1, 1], [], []>} : vector<10x10xbf16>, vector<10x8xbf16>, vector<10x8xf32> -> vector<10x8xf32>
    %127 = vector.extract_strided_slice %75 {offsets = [8, 0], sizes = [8, 32], strides = [1, 1]} : vector<32x32xbf16> to vector<8x32xbf16>
    %128 = arith.truncf %126 : vector<10x8xf32> to vector<10x8xbf16>
    %cst_52 = arith.constant dense<0.000000e+00> : vector<10x32xf32>
    %129 = tpu.matmul %128, %127, %cst_52 {dimension_numbers = #tpu.dot_dimension_numbers<[1], [0], [0], [1], [0, 0, 1, 1], [], []>} : vector<10x8xbf16>, vector<8x32xbf16>, vector<10x32xf32> -> vector<10x32xf32>
    %130 = arith.addf %103, %129 : vector<10x32xf32>
    %131 = vector.extract_strided_slice %73 {offsets = [0, 16], sizes = [10, 8], strides = [1, 1]} : vector<10x96xf32> to vector<10x8xf32>
    %cst_53 = arith.constant 0.353553385 : f32
    %132 = vector.broadcast %cst_53 : f32 to vector<10x8xf32>
    %133 = arith.mulf %131, %132 : vector<10x8xf32>
    %134 = vector.extract_strided_slice %73 {offsets = [0, 48], sizes = [10, 8], strides = [1, 1]} : vector<10x96xf32> to vector<10x8xf32>
    %135 = vector.extract_strided_slice %73 {offsets = [0, 80], sizes = [10, 8], strides = [1, 1]} : vector<10x96xf32> to vector<10x8xf32>
    %136 = arith.truncf %133 : vector<10x8xf32> to vector<10x8xbf16>
    %137 = arith.truncf %134 : vector<10x8xf32> to vector<10x8xbf16>
    %cst_54 = arith.constant dense<0.000000e+00> : vector<10x10xf32>
    %138 = tpu.matmul %136, %137, %cst_54 {dimension_numbers = #tpu.dot_dimension_numbers<[1], [1], [0], [0], [0, 0, 1, 0], [], []>} : vector<10x8xbf16>, vector<10x8xbf16>, vector<10x10xf32> -> vector<10x10xf32>
    %139 = vector.broadcast %39 : vector<1x10xf32> to vector<10x10xf32>
    %140 = arith.addf %138, %139 : vector<10x10xf32>
    %cst_55 = arith.constant dense<0xFF800000> : vector<10xf32>
    %141 = vector.multi_reduction <maximumf>, %140, %cst_55 [1] : vector<10x10xf32> to vector<10xf32>
    %142 = vector.shape_cast %141 : vector<10xf32> to vector<10x1xf32>
    %143 = vector.broadcast %142 : vector<10x1xf32> to vector<10x10xf32>
    %144 = arith.subf %140, %143 : vector<10x10xf32>
    %145 = math.exp %144 : vector<10x10xf32>
    %cst_56 = arith.constant dense<0.000000e+00> : vector<10xf32>
    %146 = vector.multi_reduction <add>, %145, %cst_56 [1] : vector<10x10xf32> to vector<10xf32>
    %147 = vector.shape_cast %146 : vector<10xf32> to vector<10x1xf32>
    %148 = tpu.reciprocal %147 {approx = true} : vector<10x1xf32> -> vector<10x1xf32>
    %149 = vector.broadcast %148 : vector<10x1xf32> to vector<10x10xf32>
    %150 = arith.mulf %145, %149 : vector<10x10xf32>
    %151 = arith.truncf %150 : vector<10x10xf32> to vector<10x10xbf16>
    %152 = arith.truncf %135 : vector<10x8xf32> to vector<10x8xbf16>
    %cst_57 = arith.constant dense<0.000000e+00> : vector<10x8xf32>
    %153 = tpu.matmul %151, %152, %cst_57 {dimension_numbers = #tpu.dot_dimension_numbers<[1], [0], [0], [1], [0, 0, 1, 1], [], []>} : vector<10x10xbf16>, vector<10x8xbf16>, vector<10x8xf32> -> vector<10x8xf32>
    %154 = vector.extract_strided_slice %75 {offsets = [16, 0], sizes = [8, 32], strides = [1, 1]} : vector<32x32xbf16> to vector<8x32xbf16>
    %155 = arith.truncf %153 : vector<10x8xf32> to vector<10x8xbf16>
    %cst_58 = arith.constant dense<0.000000e+00> : vector<10x32xf32>
    %156 = tpu.matmul %155, %154, %cst_58 {dimension_numbers = #tpu.dot_dimension_numbers<[1], [0], [0], [1], [0, 0, 1, 1], [], []>} : vector<10x8xbf16>, vector<8x32xbf16>, vector<10x32xf32> -> vector<10x32xf32>
    %157 = arith.addf %130, %156 : vector<10x32xf32>
    %158 = vector.extract_strided_slice %73 {offsets = [0, 24], sizes = [10, 8], strides = [1, 1]} : vector<10x96xf32> to vector<10x8xf32>
    %cst_59 = arith.constant 0.353553385 : f32
    %159 = vector.broadcast %cst_59 : f32 to vector<10x8xf32>
    %160 = arith.mulf %158, %159 : vector<10x8xf32>
    %161 = vector.extract_strided_slice %73 {offsets = [0, 56], sizes = [10, 8], strides = [1, 1]} : vector<10x96xf32> to vector<10x8xf32>
    %162 = vector.extract_strided_slice %73 {offsets = [0, 88], sizes = [10, 8], strides = [1, 1]} : vector<10x96xf32> to vector<10x8xf32>
    %163 = arith.truncf %160 : vector<10x8xf32> to vector<10x8xbf16>
    %164 = arith.truncf %161 : vector<10x8xf32> to vector<10x8xbf16>
    %cst_60 = arith.constant dense<0.000000e+00> : vector<10x10xf32>
    %165 = tpu.matmul %163, %164, %cst_60 {dimension_numbers = #tpu.dot_dimension_numbers<[1], [1], [0], [0], [0, 0, 1, 0], [], []>} : vector<10x8xbf16>, vector<10x8xbf16>, vector<10x10xf32> -> vector<10x10xf32>
    %166 = vector.broadcast %39 : vector<1x10xf32> to vector<10x10xf32>
    %167 = arith.addf %165, %166 : vector<10x10xf32>
    %cst_61 = arith.constant dense<0xFF800000> : vector<10xf32>
    %168 = vector.multi_reduction <maximumf>, %167, %cst_61 [1] : vector<10x10xf32> to vector<10xf32>
    %169 = vector.shape_cast %168 : vector<10xf32> to vector<10x1xf32>
    %170 = vector.broadcast %169 : vector<10x1xf32> to vector<10x10xf32>
    %171 = arith.subf %167, %170 : vector<10x10xf32>
    %172 = math.exp %171 : vector<10x10xf32>
    %cst_62 = arith.constant dense<0.000000e+00> : vector<10xf32>
    %173 = vector.multi_reduction <add>, %172, %cst_62 [1] : vector<10x10xf32> to vector<10xf32>
    %174 = vector.shape_cast %173 : vector<10xf32> to vector<10x1xf32>
    %175 = tpu.reciprocal %174 {approx = true} : vector<10x1xf32> -> vector<10x1xf32>
    %176 = vector.broadcast %175 : vector<10x1xf32> to vector<10x10xf32>
    %177 = arith.mulf %172, %176 : vector<10x10xf32>
    %178 = arith.truncf %177 : vector<10x10xf32> to vector<10x10xbf16>
    %179 = arith.truncf %162 : vector<10x8xf32> to vector<10x8xbf16>
    %cst_63 = arith.constant dense<0.000000e+00> : vector<10x8xf32>
    %180 = tpu.matmul %178, %179, %cst_63 {dimension_numbers = #tpu.dot_dimension_numbers<[1], [0], [0], [1], [0, 0, 1, 1], [], []>} : vector<10x10xbf16>, vector<10x8xbf16>, vector<10x8xf32> -> vector<10x8xf32>
    %181 = vector.extract_strided_slice %75 {offsets = [24, 0], sizes = [8, 32], strides = [1, 1]} : vector<32x32xbf16> to vector<8x32xbf16>
    %182 = arith.truncf %180 : vector<10x8xf32> to vector<10x8xbf16>
    %cst_64 = arith.constant dense<0.000000e+00> : vector<10x32xf32>
    %183 = tpu.matmul %182, %181, %cst_64 {dimension_numbers = #tpu.dot_dimension_numbers<[1], [0], [0], [1], [0, 0, 1, 1], [], []>} : vector<10x8xbf16>, vector<8x32xbf16>, vector<10x32xf32> -> vector<10x32xf32>
    %184 = arith.addf %157, %183 : vector<10x32xf32>
    %185 = arith.addf %37, %184 : vector<10x32xf32>
    %c0_65 = arith.constant 0 : index
    %c0_66 = arith.constant 0 : index
    %c0_67 = arith.constant 0 : index
    %186 = vector.load %arg16[%c0_65, %c0_66, %c0_67] : memref<2x1x32xf32, #tpu.memory_space<vmem>>, vector<1x1x32xf32>
    %187 = vector.shape_cast %186 : vector<1x1x32xf32> to vector<1x32xf32>
    %188 = vector.broadcast %187 : vector<1x32xf32> to vector<10x32xf32>
    %189 = arith.addf %185, %188 : vector<10x32xf32>
    %c0_68 = arith.constant 0 : index
    %c0_69 = arith.constant 0 : index
    %c0_70 = arith.constant 0 : index
    %190 = vector.load %arg17[%c0_68, %c0_69, %c0_70] : memref<2x1x32xf32, #tpu.memory_space<vmem>>, vector<1x1x32xf32>
    %191 = vector.shape_cast %190 : vector<1x1x32xf32> to vector<1x32xf32>
    %c0_71 = arith.constant 0 : index
    %c0_72 = arith.constant 0 : index
    %c0_73 = arith.constant 0 : index
    %192 = vector.load %arg18[%c0_71, %c0_72, %c0_73] : memref<2x1x32xf32, #tpu.memory_space<vmem>>, vector<1x1x32xf32>
    %193 = vector.shape_cast %192 : vector<1x1x32xf32> to vector<1x32xf32>
    %cst_74 = arith.constant dense<0.000000e+00> : vector<10xf32>
    %194 = vector.multi_reduction <add>, %189, %cst_74 [1] : vector<10x32xf32> to vector<10xf32>
    %195 = vector.shape_cast %194 : vector<10xf32> to vector<10x1xf32>
    %cst_75 = arith.constant 3.200000e+01 : f32
    %196 = vector.broadcast %cst_75 : f32 to vector<10x1xf32>
    %197 = arith.divf %195, %196 : vector<10x1xf32>
    %198 = vector.broadcast %197 : vector<10x1xf32> to vector<10x32xf32>
    %199 = arith.subf %189, %198 : vector<10x32xf32>
    %200 = arith.mulf %199, %199 : vector<10x32xf32>
    %cst_76 = arith.constant dense<0.000000e+00> : vector<10xf32>
    %201 = vector.multi_reduction <add>, %200, %cst_76 [1] : vector<10x32xf32> to vector<10xf32>
    %202 = vector.shape_cast %201 : vector<10xf32> to vector<10x1xf32>
    %cst_77 = arith.constant 3.200000e+01 : f32
    %203 = vector.broadcast %cst_77 : f32 to vector<10x1xf32>
    %204 = arith.divf %202, %203 : vector<10x1xf32>
    %205 = vector.broadcast %197 : vector<10x1xf32> to vector<10x32xf32>
    %206 = arith.subf %189, %205 : vector<10x32xf32>
    %cst_78 = arith.constant 9.99999974E-6 : f32
    %207 = vector.broadcast %cst_78 : f32 to vector<10x1xf32>
    %208 = arith.addf %204, %207 : vector<10x1xf32>
    %209 = math.rsqrt %208 : vector<10x1xf32>
    %210 = vector.broadcast %209 : vector<10x1xf32> to vector<10x32xf32>
    %211 = arith.mulf %206, %210 : vector<10x32xf32>
    %212 = vector.broadcast %191 : vector<1x32xf32> to vector<10x32xf32>
    %213 = arith.mulf %211, %212 : vector<10x32xf32>
    %214 = vector.broadcast %193 : vector<1x32xf32> to vector<10x32xf32>
    %215 = arith.addf %213, %214 : vector<10x32xf32>
    %c0_79 = arith.constant 0 : index
    %c0_80 = arith.constant 0 : index
    %c0_81 = arith.constant 0 : index
    %216 = vector.load %arg19[%c0_79, %c0_80, %c0_81] : memref<2x32x64xbf16, #tpu.memory_space<vmem>>, vector<1x32x64xbf16>
    %217 = vector.shape_cast %216 : vector<1x32x64xbf16> to vector<32x64xbf16>
    %218 = arith.truncf %215 : vector<10x32xf32> to vector<10x32xbf16>
    %cst_82 = arith.constant dense<0.000000e+00> : vector<10x64xf32>
    %219 = tpu.matmul %218, %217, %cst_82 {dimension_numbers = #tpu.dot_dimension_numbers<[1], [0], [0], [1], [0, 0, 1, 1], [], []>} : vector<10x32xbf16>, vector<32x64xbf16>, vector<10x64xf32> -> vector<10x64xf32>
    %c0_83 = arith.constant 0 : index
    %c0_84 = arith.constant 0 : index
    %c0_85 = arith.constant 0 : index
    %220 = vector.load %arg20[%c0_83, %c0_84, %c0_85] : memref<2x1x64xf32, #tpu.memory_space<vmem>>, vector<1x1x64xf32>
    %221 = vector.shape_cast %220 : vector<1x1x64xf32> to vector<1x64xf32>
    %222 = vector.broadcast %221 : vector<1x64xf32> to vector<10x64xf32>
    %223 = arith.addf %219, %222 : vector<10x64xf32>
    %224 = arith.mulf %223, %223 : vector<10x64xf32>
    %225 = arith.mulf %223, %224 : vector<10x64xf32>
    %cst_86 = arith.constant 4.471500e-02 : f32
    %226 = vector.broadcast %cst_86 : f32 to vector<10x64xf32>
    %227 = arith.mulf %226, %225 : vector<10x64xf32>
    %228 = arith.addf %223, %227 : vector<10x64xf32>
    %cst_87 = arith.constant 0.797884583 : f32
    %229 = vector.broadcast %cst_87 : f32 to vector<10x64xf32>
    %230 = arith.mulf %229, %228 : vector<10x64xf32>
    %231 = math.tanh %230 : vector<10x64xf32>
    %cst_88 = arith.constant 1.000000e+00 : f32
    %232 = vector.broadcast %cst_88 : f32 to vector<10x64xf32>
    %233 = arith.addf %232, %231 : vector<10x64xf32>
    %cst_89 = arith.constant 5.000000e-01 : f32
    %234 = vector.broadcast %cst_89 : f32 to vector<10x64xf32>
    %235 = arith.mulf %234, %233 : vector<10x64xf32>
    %236 = arith.mulf %223, %235 : vector<10x64xf32>
    %c0_90 = arith.constant 0 : index
    %c0_91 = arith.constant 0 : index
    %c0_92 = arith.constant 0 : index
    %237 = vector.load %arg21[%c0_90, %c0_91, %c0_92] : memref<2x64x32xbf16, #tpu.memory_space<vmem>>, vector<1x64x32xbf16>
    %238 = vector.shape_cast %237 : vector<1x64x32xbf16> to vector<64x32xbf16>
    %239 = arith.truncf %236 : vector<10x64xf32> to vector<10x64xbf16>
    %cst_93 = arith.constant dense<0.000000e+00> : vector<10x32xf32>
    %240 = tpu.matmul %239, %238, %cst_93 {dimension_numbers = #tpu.dot_dimension_numbers<[1], [0], [0], [1], [0, 0, 1, 1], [], []>} : vector<10x64xbf16>, vector<64x32xbf16>, vector<10x32xf32> -> vector<10x32xf32>
    %241 = arith.addf %189, %240 : vector<10x32xf32>
    %c0_94 = arith.constant 0 : index
    %c0_95 = arith.constant 0 : index
    %c0_96 = arith.constant 0 : index
    %242 = vector.load %arg22[%c0_94, %c0_95, %c0_96] : memref<2x1x32xf32, #tpu.memory_space<vmem>>, vector<1x1x32xf32>
    %243 = vector.shape_cast %242 : vector<1x1x32xf32> to vector<1x32xf32>
    %244 = vector.broadcast %243 : vector<1x32xf32> to vector<10x32xf32>
    %245 = arith.addf %241, %244 : vector<10x32xf32>
    %c1 = arith.constant 1 : index
    %c0_97 = arith.constant 0 : index
    %c0_98 = arith.constant 0 : index
    %246 = vector.load %arg11[%c1, %c0_97, %c0_98] : memref<2x1x32xf32, #tpu.memory_space<vmem>>, vector<1x1x32xf32>
    %247 = vector.shape_cast %246 : vector<1x1x32xf32> to vector<1x32xf32>
    %c1_99 = arith.constant 1 : index
    %c0_100 = arith.constant 0 : index
    %c0_101 = arith.constant 0 : index
    %248 = vector.load %arg12[%c1_99, %c0_100, %c0_101] : memref<2x1x32xf32, #tpu.memory_space<vmem>>, vector<1x1x32xf32>
    %249 = vector.shape_cast %248 : vector<1x1x32xf32> to vector<1x32xf32>
    %cst_102 = arith.constant dense<0.000000e+00> : vector<10xf32>
    %250 = vector.multi_reduction <add>, %245, %cst_102 [1] : vector<10x32xf32> to vector<10xf32>
    %251 = vector.shape_cast %250 : vector<10xf32> to vector<10x1xf32>
    %cst_103 = arith.constant 3.200000e+01 : f32
    %252 = vector.broadcast %cst_103 : f32 to vector<10x1xf32>
    %253 = arith.divf %251, %252 : vector<10x1xf32>
    %254 = vector.broadcast %253 : vector<10x1xf32> to vector<10x32xf32>
    %255 = arith.subf %245, %254 : vector<10x32xf32>
    %256 = arith.mulf %255, %255 : vector<10x32xf32>
    %cst_104 = arith.constant dense<0.000000e+00> : vector<10xf32>
    %257 = vector.multi_reduction <add>, %256, %cst_104 [1] : vector<10x32xf32> to vector<10xf32>
    %258 = vector.shape_cast %257 : vector<10xf32> to vector<10x1xf32>
    %cst_105 = arith.constant 3.200000e+01 : f32
    %259 = vector.broadcast %cst_105 : f32 to vector<10x1xf32>
    %260 = arith.divf %258, %259 : vector<10x1xf32>
    %261 = vector.broadcast %253 : vector<10x1xf32> to vector<10x32xf32>
    %262 = arith.subf %245, %261 : vector<10x32xf32>
    %cst_106 = arith.constant 9.99999974E-6 : f32
    %263 = vector.broadcast %cst_106 : f32 to vector<10x1xf32>
    %264 = arith.addf %260, %263 : vector<10x1xf32>
    %265 = math.rsqrt %264 : vector<10x1xf32>
    %266 = vector.broadcast %265 : vector<10x1xf32> to vector<10x32xf32>
    %267 = arith.mulf %262, %266 : vector<10x32xf32>
    %268 = vector.broadcast %247 : vector<1x32xf32> to vector<10x32xf32>
    %269 = arith.mulf %267, %268 : vector<10x32xf32>
    %270 = vector.broadcast %249 : vector<1x32xf32> to vector<10x32xf32>
    %271 = arith.addf %269, %270 : vector<10x32xf32>
    %c1_107 = arith.constant 1 : index
    %c0_108 = arith.constant 0 : index
    %c0_109 = arith.constant 0 : index
    %272 = vector.load %arg13[%c1_107, %c0_108, %c0_109] : memref<2x32x96xbf16, #tpu.memory_space<vmem>>, vector<1x32x96xbf16>
    %273 = vector.shape_cast %272 : vector<1x32x96xbf16> to vector<32x96xbf16>
    %274 = arith.truncf %271 : vector<10x32xf32> to vector<10x32xbf16>
    %cst_110 = arith.constant dense<0.000000e+00> : vector<10x96xf32>
    %275 = tpu.matmul %274, %273, %cst_110 {dimension_numbers = #tpu.dot_dimension_numbers<[1], [0], [0], [1], [0, 0, 1, 1], [], []>} : vector<10x32xbf16>, vector<32x96xbf16>, vector<10x96xf32> -> vector<10x96xf32>
    %c1_111 = arith.constant 1 : index
    %c0_112 = arith.constant 0 : index
    %c0_113 = arith.constant 0 : index
    %276 = vector.load %arg14[%c1_111, %c0_112, %c0_113] : memref<2x1x96xf32, #tpu.memory_space<vmem>>, vector<1x1x96xf32>
    %277 = vector.shape_cast %276 : vector<1x1x96xf32> to vector<1x96xf32>
    %278 = vector.broadcast %277 : vector<1x96xf32> to vector<10x96xf32>
    %279 = arith.addf %275, %278 : vector<10x96xf32>
    %c1_114 = arith.constant 1 : index
    %c0_115 = arith.constant 0 : index
    %c0_116 = arith.constant 0 : index
    %280 = vector.load %arg15[%c1_114, %c0_115, %c0_116] : memref<2x32x32xbf16, #tpu.memory_space<vmem>>, vector<1x32x32xbf16>
    %281 = vector.shape_cast %280 : vector<1x32x32xbf16> to vector<32x32xbf16>
    %cst_117 = arith.constant 0.000000e+00 : f32
    %282 = vector.broadcast %cst_117 : f32 to vector<10x32xf32>
    %283 = vector.extract_strided_slice %279 {offsets = [0, 0], sizes = [10, 8], strides = [1, 1]} : vector<10x96xf32> to vector<10x8xf32>
    %cst_118 = arith.constant 0.353553385 : f32
    %284 = vector.broadcast %cst_118 : f32 to vector<10x8xf32>
    %285 = arith.mulf %283, %284 : vector<10x8xf32>
    %286 = vector.extract_strided_slice %279 {offsets = [0, 32], sizes = [10, 8], strides = [1, 1]} : vector<10x96xf32> to vector<10x8xf32>
    %287 = vector.extract_strided_slice %279 {offsets = [0, 64], sizes = [10, 8], strides = [1, 1]} : vector<10x96xf32> to vector<10x8xf32>
    %288 = arith.truncf %285 : vector<10x8xf32> to vector<10x8xbf16>
    %289 = arith.truncf %286 : vector<10x8xf32> to vector<10x8xbf16>
    %cst_119 = arith.constant dense<0.000000e+00> : vector<10x10xf32>
    %290 = tpu.matmul %288, %289, %cst_119 {dimension_numbers = #tpu.dot_dimension_numbers<[1], [1], [0], [0], [0, 0, 1, 0], [], []>} : vector<10x8xbf16>, vector<10x8xbf16>, vector<10x10xf32> -> vector<10x10xf32>
    %291 = vector.broadcast %39 : vector<1x10xf32> to vector<10x10xf32>
    %292 = arith.addf %290, %291 : vector<10x10xf32>
    %cst_120 = arith.constant dense<0xFF800000> : vector<10xf32>
    %293 = vector.multi_reduction <maximumf>, %292, %cst_120 [1] : vector<10x10xf32> to vector<10xf32>
    %294 = vector.shape_cast %293 : vector<10xf32> to vector<10x1xf32>
    %295 = vector.broadcast %294 : vector<10x1xf32> to vector<10x10xf32>
    %296 = arith.subf %292, %295 : vector<10x10xf32>
    %297 = math.exp %296 : vector<10x10xf32>
    %cst_121 = arith.constant dense<0.000000e+00> : vector<10xf32>
    %298 = vector.multi_reduction <add>, %297, %cst_121 [1] : vector<10x10xf32> to vector<10xf32>
    %299 = vector.shape_cast %298 : vector<10xf32> to vector<10x1xf32>
    %300 = tpu.reciprocal %299 {approx = true} : vector<10x1xf32> -> vector<10x1xf32>
    %301 = vector.broadcast %300 : vector<10x1xf32> to vector<10x10xf32>
    %302 = arith.mulf %297, %301 : vector<10x10xf32>
    %303 = arith.truncf %302 : vector<10x10xf32> to vector<10x10xbf16>
    %304 = arith.truncf %287 : vector<10x8xf32> to vector<10x8xbf16>
    %cst_122 = arith.constant dense<0.000000e+00> : vector<10x8xf32>
    %305 = tpu.matmul %303, %304, %cst_122 {dimension_numbers = #tpu.dot_dimension_numbers<[1], [0], [0], [1], [0, 0, 1, 1], [], []>} : vector<10x10xbf16>, vector<10x8xbf16>, vector<10x8xf32> -> vector<10x8xf32>
    %306 = vector.extract_strided_slice %281 {offsets = [0, 0], sizes = [8, 32], strides = [1, 1]} : vector<32x32xbf16> to vector<8x32xbf16>
    %307 = arith.truncf %305 : vector<10x8xf32> to vector<10x8xbf16>
    %cst_123 = arith.constant dense<0.000000e+00> : vector<10x32xf32>
    %308 = tpu.matmul %307, %306, %cst_123 {dimension_numbers = #tpu.dot_dimension_numbers<[1], [0], [0], [1], [0, 0, 1, 1], [], []>} : vector<10x8xbf16>, vector<8x32xbf16>, vector<10x32xf32> -> vector<10x32xf32>
    %309 = arith.addf %282, %308 : vector<10x32xf32>
    %310 = vector.extract_strided_slice %279 {offsets = [0, 8], sizes = [10, 8], strides = [1, 1]} : vector<10x96xf32> to vector<10x8xf32>
    %cst_124 = arith.constant 0.353553385 : f32
    %311 = vector.broadcast %cst_124 : f32 to vector<10x8xf32>
    %312 = arith.mulf %310, %311 : vector<10x8xf32>
    %313 = vector.extract_strided_slice %279 {offsets = [0, 40], sizes = [10, 8], strides = [1, 1]} : vector<10x96xf32> to vector<10x8xf32>
    %314 = vector.extract_strided_slice %279 {offsets = [0, 72], sizes = [10, 8], strides = [1, 1]} : vector<10x96xf32> to vector<10x8xf32>
    %315 = arith.truncf %312 : vector<10x8xf32> to vector<10x8xbf16>
    %316 = arith.truncf %313 : vector<10x8xf32> to vector<10x8xbf16>
    %cst_125 = arith.constant dense<0.000000e+00> : vector<10x10xf32>
    %317 = tpu.matmul %315, %316, %cst_125 {dimension_numbers = #tpu.dot_dimension_numbers<[1], [1], [0], [0], [0, 0, 1, 0], [], []>} : vector<10x8xbf16>, vector<10x8xbf16>, vector<10x10xf32> -> vector<10x10xf32>
    %318 = vector.broadcast %39 : vector<1x10xf32> to vector<10x10xf32>
    %319 = arith.addf %317, %318 : vector<10x10xf32>
    %cst_126 = arith.constant dense<0xFF800000> : vector<10xf32>
    %320 = vector.multi_reduction <maximumf>, %319, %cst_126 [1] : vector<10x10xf32> to vector<10xf32>
    %321 = vector.shape_cast %320 : vector<10xf32> to vector<10x1xf32>
    %322 = vector.broadcast %321 : vector<10x1xf32> to vector<10x10xf32>
    %323 = arith.subf %319, %322 : vector<10x10xf32>
    %324 = math.exp %323 : vector<10x10xf32>
    %cst_127 = arith.constant dense<0.000000e+00> : vector<10xf32>
    %325 = vector.multi_reduction <add>, %324, %cst_127 [1] : vector<10x10xf32> to vector<10xf32>
    %326 = vector.shape_cast %325 : vector<10xf32> to vector<10x1xf32>
    %327 = tpu.reciprocal %326 {approx = true} : vector<10x1xf32> -> vector<10x1xf32>
    %328 = vector.broadcast %327 : vector<10x1xf32> to vector<10x10xf32>
    %329 = arith.mulf %324, %328 : vector<10x10xf32>
    %330 = arith.truncf %329 : vector<10x10xf32> to vector<10x10xbf16>
    %331 = arith.truncf %314 : vector<10x8xf32> to vector<10x8xbf16>
    %cst_128 = arith.constant dense<0.000000e+00> : vector<10x8xf32>
    %332 = tpu.matmul %330, %331, %cst_128 {dimension_numbers = #tpu.dot_dimension_numbers<[1], [0], [0], [1], [0, 0, 1, 1], [], []>} : vector<10x10xbf16>, vector<10x8xbf16>, vector<10x8xf32> -> vector<10x8xf32>
    %333 = vector.extract_strided_slice %281 {offsets = [8, 0], sizes = [8, 32], strides = [1, 1]} : vector<32x32xbf16> to vector<8x32xbf16>
    %334 = arith.truncf %332 : vector<10x8xf32> to vector<10x8xbf16>
    %cst_129 = arith.constant dense<0.000000e+00> : vector<10x32xf32>
    %335 = tpu.matmul %334, %333, %cst_129 {dimension_numbers = #tpu.dot_dimension_numbers<[1], [0], [0], [1], [0, 0, 1, 1], [], []>} : vector<10x8xbf16>, vector<8x32xbf16>, vector<10x32xf32> -> vector<10x32xf32>
    %336 = arith.addf %309, %335 : vector<10x32xf32>
    %337 = vector.extract_strided_slice %279 {offsets = [0, 16], sizes = [10, 8], strides = [1, 1]} : vector<10x96xf32> to vector<10x8xf32>
    %cst_130 = arith.constant 0.353553385 : f32
    %338 = vector.broadcast %cst_130 : f32 to vector<10x8xf32>
    %339 = arith.mulf %337, %338 : vector<10x8xf32>
    %340 = vector.extract_strided_slice %279 {offsets = [0, 48], sizes = [10, 8], strides = [1, 1]} : vector<10x96xf32> to vector<10x8xf32>
    %341 = vector.extract_strided_slice %279 {offsets = [0, 80], sizes = [10, 8], strides = [1, 1]} : vector<10x96xf32> to vector<10x8xf32>
    %342 = arith.truncf %339 : vector<10x8xf32> to vector<10x8xbf16>
    %343 = arith.truncf %340 : vector<10x8xf32> to vector<10x8xbf16>
    %cst_131 = arith.constant dense<0.000000e+00> : vector<10x10xf32>
    %344 = tpu.matmul %342, %343, %cst_131 {dimension_numbers = #tpu.dot_dimension_numbers<[1], [1], [0], [0], [0, 0, 1, 0], [], []>} : vector<10x8xbf16>, vector<10x8xbf16>, vector<10x10xf32> -> vector<10x10xf32>
    %345 = vector.broadcast %39 : vector<1x10xf32> to vector<10x10xf32>
    %346 = arith.addf %344, %345 : vector<10x10xf32>
    %cst_132 = arith.constant dense<0xFF800000> : vector<10xf32>
    %347 = vector.multi_reduction <maximumf>, %346, %cst_132 [1] : vector<10x10xf32> to vector<10xf32>
    %348 = vector.shape_cast %347 : vector<10xf32> to vector<10x1xf32>
    %349 = vector.broadcast %348 : vector<10x1xf32> to vector<10x10xf32>
    %350 = arith.subf %346, %349 : vector<10x10xf32>
    %351 = math.exp %350 : vector<10x10xf32>
    %cst_133 = arith.constant dense<0.000000e+00> : vector<10xf32>
    %352 = vector.multi_reduction <add>, %351, %cst_133 [1] : vector<10x10xf32> to vector<10xf32>
    %353 = vector.shape_cast %352 : vector<10xf32> to vector<10x1xf32>
    %354 = tpu.reciprocal %353 {approx = true} : vector<10x1xf32> -> vector<10x1xf32>
    %355 = vector.broadcast %354 : vector<10x1xf32> to vector<10x10xf32>
    %356 = arith.mulf %351, %355 : vector<10x10xf32>
    %357 = arith.truncf %356 : vector<10x10xf32> to vector<10x10xbf16>
    %358 = arith.truncf %341 : vector<10x8xf32> to vector<10x8xbf16>
    %cst_134 = arith.constant dense<0.000000e+00> : vector<10x8xf32>
    %359 = tpu.matmul %357, %358, %cst_134 {dimension_numbers = #tpu.dot_dimension_numbers<[1], [0], [0], [1], [0, 0, 1, 1], [], []>} : vector<10x10xbf16>, vector<10x8xbf16>, vector<10x8xf32> -> vector<10x8xf32>
    %360 = vector.extract_strided_slice %281 {offsets = [16, 0], sizes = [8, 32], strides = [1, 1]} : vector<32x32xbf16> to vector<8x32xbf16>
    %361 = arith.truncf %359 : vector<10x8xf32> to vector<10x8xbf16>
    %cst_135 = arith.constant dense<0.000000e+00> : vector<10x32xf32>
    %362 = tpu.matmul %361, %360, %cst_135 {dimension_numbers = #tpu.dot_dimension_numbers<[1], [0], [0], [1], [0, 0, 1, 1], [], []>} : vector<10x8xbf16>, vector<8x32xbf16>, vector<10x32xf32> -> vector<10x32xf32>
    %363 = arith.addf %336, %362 : vector<10x32xf32>
    %364 = vector.extract_strided_slice %279 {offsets = [0, 24], sizes = [10, 8], strides = [1, 1]} : vector<10x96xf32> to vector<10x8xf32>
    %cst_136 = arith.constant 0.353553385 : f32
    %365 = vector.broadcast %cst_136 : f32 to vector<10x8xf32>
    %366 = arith.mulf %364, %365 : vector<10x8xf32>
    %367 = vector.extract_strided_slice %279 {offsets = [0, 56], sizes = [10, 8], strides = [1, 1]} : vector<10x96xf32> to vector<10x8xf32>
    %368 = vector.extract_strided_slice %279 {offsets = [0, 88], sizes = [10, 8], strides = [1, 1]} : vector<10x96xf32> to vector<10x8xf32>
    %369 = arith.truncf %366 : vector<10x8xf32> to vector<10x8xbf16>
    %370 = arith.truncf %367 : vector<10x8xf32> to vector<10x8xbf16>
    %cst_137 = arith.constant dense<0.000000e+00> : vector<10x10xf32>
    %371 = tpu.matmul %369, %370, %cst_137 {dimension_numbers = #tpu.dot_dimension_numbers<[1], [1], [0], [0], [0, 0, 1, 0], [], []>} : vector<10x8xbf16>, vector<10x8xbf16>, vector<10x10xf32> -> vector<10x10xf32>
    %372 = vector.broadcast %39 : vector<1x10xf32> to vector<10x10xf32>
    %373 = arith.addf %371, %372 : vector<10x10xf32>
    %cst_138 = arith.constant dense<0xFF800000> : vector<10xf32>
    %374 = vector.multi_reduction <maximumf>, %373, %cst_138 [1] : vector<10x10xf32> to vector<10xf32>
    %375 = vector.shape_cast %374 : vector<10xf32> to vector<10x1xf32>
    %376 = vector.broadcast %375 : vector<10x1xf32> to vector<10x10xf32>
    %377 = arith.subf %373, %376 : vector<10x10xf32>
    %378 = math.exp %377 : vector<10x10xf32>
    %cst_139 = arith.constant dense<0.000000e+00> : vector<10xf32>
    %379 = vector.multi_reduction <add>, %378, %cst_139 [1] : vector<10x10xf32> to vector<10xf32>
    %380 = vector.shape_cast %379 : vector<10xf32> to vector<10x1xf32>
    %381 = tpu.reciprocal %380 {approx = true} : vector<10x1xf32> -> vector<10x1xf32>
    %382 = vector.broadcast %381 : vector<10x1xf32> to vector<10x10xf32>
    %383 = arith.mulf %378, %382 : vector<10x10xf32>
    %384 = arith.truncf %383 : vector<10x10xf32> to vector<10x10xbf16>
    %385 = arith.truncf %368 : vector<10x8xf32> to vector<10x8xbf16>
    %cst_140 = arith.constant dense<0.000000e+00> : vector<10x8xf32>
    %386 = tpu.matmul %384, %385, %cst_140 {dimension_numbers = #tpu.dot_dimension_numbers<[1], [0], [0], [1], [0, 0, 1, 1], [], []>} : vector<10x10xbf16>, vector<10x8xbf16>, vector<10x8xf32> -> vector<10x8xf32>
    %387 = vector.extract_strided_slice %281 {offsets = [24, 0], sizes = [8, 32], strides = [1, 1]} : vector<32x32xbf16> to vector<8x32xbf16>
    %388 = arith.truncf %386 : vector<10x8xf32> to vector<10x8xbf16>
    %cst_141 = arith.constant dense<0.000000e+00> : vector<10x32xf32>
    %389 = tpu.matmul %388, %387, %cst_141 {dimension_numbers = #tpu.dot_dimension_numbers<[1], [0], [0], [1], [0, 0, 1, 1], [], []>} : vector<10x8xbf16>, vector<8x32xbf16>, vector<10x32xf32> -> vector<10x32xf32>
    %390 = arith.addf %363, %389 : vector<10x32xf32>
    %391 = arith.addf %245, %390 : vector<10x32xf32>
    %c1_142 = arith.constant 1 : index
    %c0_143 = arith.constant 0 : index
    %c0_144 = arith.constant 0 : index
    %392 = vector.load %arg16[%c1_142, %c0_143, %c0_144] : memref<2x1x32xf32, #tpu.memory_space<vmem>>, vector<1x1x32xf32>
    %393 = vector.shape_cast %392 : vector<1x1x32xf32> to vector<1x32xf32>
    %394 = vector.broadcast %393 : vector<1x32xf32> to vector<10x32xf32>
    %395 = arith.addf %391, %394 : vector<10x32xf32>
    %c1_145 = arith.constant 1 : index
    %c0_146 = arith.constant 0 : index
    %c0_147 = arith.constant 0 : index
    %396 = vector.load %arg17[%c1_145, %c0_146, %c0_147] : memref<2x1x32xf32, #tpu.memory_space<vmem>>, vector<1x1x32xf32>
    %397 = vector.shape_cast %396 : vector<1x1x32xf32> to vector<1x32xf32>
    %c1_148 = arith.constant 1 : index
    %c0_149 = arith.constant 0 : index
    %c0_150 = arith.constant 0 : index
    %398 = vector.load %arg18[%c1_148, %c0_149, %c0_150] : memref<2x1x32xf32, #tpu.memory_space<vmem>>, vector<1x1x32xf32>
    %399 = vector.shape_cast %398 : vector<1x1x32xf32> to vector<1x32xf32>
    %cst_151 = arith.constant dense<0.000000e+00> : vector<10xf32>
    %400 = vector.multi_reduction <add>, %395, %cst_151 [1] : vector<10x32xf32> to vector<10xf32>
    %401 = vector.shape_cast %400 : vector<10xf32> to vector<10x1xf32>
    %cst_152 = arith.constant 3.200000e+01 : f32
    %402 = vector.broadcast %cst_152 : f32 to vector<10x1xf32>
    %403 = arith.divf %401, %402 : vector<10x1xf32>
    %404 = vector.broadcast %403 : vector<10x1xf32> to vector<10x32xf32>
    %405 = arith.subf %395, %404 : vector<10x32xf32>
    %406 = arith.mulf %405, %405 : vector<10x32xf32>
    %cst_153 = arith.constant dense<0.000000e+00> : vector<10xf32>
    %407 = vector.multi_reduction <add>, %406, %cst_153 [1] : vector<10x32xf32> to vector<10xf32>
    %408 = vector.shape_cast %407 : vector<10xf32> to vector<10x1xf32>
    %cst_154 = arith.constant 3.200000e+01 : f32
    %409 = vector.broadcast %cst_154 : f32 to vector<10x1xf32>
    %410 = arith.divf %408, %409 : vector<10x1xf32>
    %411 = vector.broadcast %403 : vector<10x1xf32> to vector<10x32xf32>
    %412 = arith.subf %395, %411 : vector<10x32xf32>
    %cst_155 = arith.constant 9.99999974E-6 : f32
    %413 = vector.broadcast %cst_155 : f32 to vector<10x1xf32>
    %414 = arith.addf %410, %413 : vector<10x1xf32>
    %415 = math.rsqrt %414 : vector<10x1xf32>
    %416 = vector.broadcast %415 : vector<10x1xf32> to vector<10x32xf32>
    %417 = arith.mulf %412, %416 : vector<10x32xf32>
    %418 = vector.broadcast %397 : vector<1x32xf32> to vector<10x32xf32>
    %419 = arith.mulf %417, %418 : vector<10x32xf32>
    %420 = vector.broadcast %399 : vector<1x32xf32> to vector<10x32xf32>
    %421 = arith.addf %419, %420 : vector<10x32xf32>
    %c1_156 = arith.constant 1 : index
    %c0_157 = arith.constant 0 : index
    %c0_158 = arith.constant 0 : index
    %422 = vector.load %arg19[%c1_156, %c0_157, %c0_158] : memref<2x32x64xbf16, #tpu.memory_space<vmem>>, vector<1x32x64xbf16>
    %423 = vector.shape_cast %422 : vector<1x32x64xbf16> to vector<32x64xbf16>
    %424 = arith.truncf %421 : vector<10x32xf32> to vector<10x32xbf16>
    %cst_159 = arith.constant dense<0.000000e+00> : vector<10x64xf32>
    %425 = tpu.matmul %424, %423, %cst_159 {dimension_numbers = #tpu.dot_dimension_numbers<[1], [0], [0], [1], [0, 0, 1, 1], [], []>} : vector<10x32xbf16>, vector<32x64xbf16>, vector<10x64xf32> -> vector<10x64xf32>
    %c1_160 = arith.constant 1 : index
    %c0_161 = arith.constant 0 : index
    %c0_162 = arith.constant 0 : index
    %426 = vector.load %arg20[%c1_160, %c0_161, %c0_162] : memref<2x1x64xf32, #tpu.memory_space<vmem>>, vector<1x1x64xf32>
    %427 = vector.shape_cast %426 : vector<1x1x64xf32> to vector<1x64xf32>
    %428 = vector.broadcast %427 : vector<1x64xf32> to vector<10x64xf32>
    %429 = arith.addf %425, %428 : vector<10x64xf32>
    %430 = arith.mulf %429, %429 : vector<10x64xf32>
    %431 = arith.mulf %429, %430 : vector<10x64xf32>
    %cst_163 = arith.constant 4.471500e-02 : f32
    %432 = vector.broadcast %cst_163 : f32 to vector<10x64xf32>
    %433 = arith.mulf %432, %431 : vector<10x64xf32>
    %434 = arith.addf %429, %433 : vector<10x64xf32>
    %cst_164 = arith.constant 0.797884583 : f32
    %435 = vector.broadcast %cst_164 : f32 to vector<10x64xf32>
    %436 = arith.mulf %435, %434 : vector<10x64xf32>
    %437 = math.tanh %436 : vector<10x64xf32>
    %cst_165 = arith.constant 1.000000e+00 : f32
    %438 = vector.broadcast %cst_165 : f32 to vector<10x64xf32>
    %439 = arith.addf %438, %437 : vector<10x64xf32>
    %cst_166 = arith.constant 5.000000e-01 : f32
    %440 = vector.broadcast %cst_166 : f32 to vector<10x64xf32>
    %441 = arith.mulf %440, %439 : vector<10x64xf32>
    %442 = arith.mulf %429, %441 : vector<10x64xf32>
    %c1_167 = arith.constant 1 : index
    %c0_168 = arith.constant 0 : index
    %c0_169 = arith.constant 0 : index
    %443 = vector.load %arg21[%c1_167, %c0_168, %c0_169] : memref<2x64x32xbf16, #tpu.memory_space<vmem>>, vector<1x64x32xbf16>
    %444 = vector.shape_cast %443 : vector<1x64x32xbf16> to vector<64x32xbf16>
    %445 = arith.truncf %442 : vector<10x64xf32> to vector<10x64xbf16>
    %cst_170 = arith.constant dense<0.000000e+00> : vector<10x32xf32>
    %446 = tpu.matmul %445, %444, %cst_170 {dimension_numbers = #tpu.dot_dimension_numbers<[1], [0], [0], [1], [0, 0, 1, 1], [], []>} : vector<10x64xbf16>, vector<64x32xbf16>, vector<10x32xf32> -> vector<10x32xf32>
    %447 = arith.addf %395, %446 : vector<10x32xf32>
    %c1_171 = arith.constant 1 : index
    %c0_172 = arith.constant 0 : index
    %c0_173 = arith.constant 0 : index
    %448 = vector.load %arg22[%c1_171, %c0_172, %c0_173] : memref<2x1x32xf32, #tpu.memory_space<vmem>>, vector<1x1x32xf32>
    %449 = vector.shape_cast %448 : vector<1x1x32xf32> to vector<1x32xf32>
    %450 = vector.broadcast %449 : vector<1x32xf32> to vector<10x32xf32>
    %451 = arith.addf %447, %450 : vector<10x32xf32>
    %c0_174 = arith.constant 0 : index
    %c0_175 = arith.constant 0 : index
    %452 = vector.load %arg9[%c0_174, %c0_175] : memref<1x32xf32, #tpu.memory_space<vmem>>, vector<1x32xf32>
    %c0_176 = arith.constant 0 : index
    %c0_177 = arith.constant 0 : index
    %453 = vector.load %arg10[%c0_176, %c0_177] : memref<1x32xf32, #tpu.memory_space<vmem>>, vector<1x32xf32>
    %cst_178 = arith.constant dense<0.000000e+00> : vector<10xf32>
    %454 = vector.multi_reduction <add>, %451, %cst_178 [1] : vector<10x32xf32> to vector<10xf32>
    %455 = vector.shape_cast %454 : vector<10xf32> to vector<10x1xf32>
    %cst_179 = arith.constant 3.200000e+01 : f32
    %456 = vector.broadcast %cst_179 : f32 to vector<10x1xf32>
    %457 = arith.divf %455, %456 : vector<10x1xf32>
    %458 = vector.broadcast %457 : vector<10x1xf32> to vector<10x32xf32>
    %459 = arith.subf %451, %458 : vector<10x32xf32>
    %460 = arith.mulf %459, %459 : vector<10x32xf32>
    %cst_180 = arith.constant dense<0.000000e+00> : vector<10xf32>
    %461 = vector.multi_reduction <add>, %460, %cst_180 [1] : vector<10x32xf32> to vector<10xf32>
    %462 = vector.shape_cast %461 : vector<10xf32> to vector<10x1xf32>
    %cst_181 = arith.constant 3.200000e+01 : f32
    %463 = vector.broadcast %cst_181 : f32 to vector<10x1xf32>
    %464 = arith.divf %462, %463 : vector<10x1xf32>
    %465 = vector.broadcast %457 : vector<10x1xf32> to vector<10x32xf32>
    %466 = arith.subf %451, %465 : vector<10x32xf32>
    %cst_182 = arith.constant 9.99999974E-6 : f32
    %467 = vector.broadcast %cst_182 : f32 to vector<10x1xf32>
    %468 = arith.addf %464, %467 : vector<10x1xf32>
    %469 = math.rsqrt %468 : vector<10x1xf32>
    %470 = vector.broadcast %469 : vector<10x1xf32> to vector<10x32xf32>
    %471 = arith.mulf %466, %470 : vector<10x32xf32>
    %472 = vector.broadcast %452 : vector<1x32xf32> to vector<10x32xf32>
    %473 = arith.mulf %471, %472 : vector<10x32xf32>
    %474 = vector.broadcast %453 : vector<1x32xf32> to vector<10x32xf32>
    %475 = arith.addf %473, %474 : vector<10x32xf32>
    %c0_183 = arith.constant 0 : index
    %c0_184 = arith.constant 0 : index
    %476 = vector.load %arg7[%c0_183, %c0_184] : memref<32x16xbf16, #tpu.memory_space<vmem>>, vector<32x16xbf16>
    %477 = arith.truncf %475 : vector<10x32xf32> to vector<10x32xbf16>
    %cst_185 = arith.constant dense<0.000000e+00> : vector<10x16xf32>
    %478 = tpu.matmul %477, %476, %cst_185 {dimension_numbers = #tpu.dot_dimension_numbers<[1], [0], [0], [1], [0, 0, 1, 1], [], []>} : vector<10x32xbf16>, vector<32x16xbf16>, vector<10x16xf32> -> vector<10x16xf32>
    %c0_186 = arith.constant 0 : index
    %c0_187 = arith.constant 0 : index
    %479 = vector.load %arg8[%c0_186, %c0_187] : memref<1x16xf32, #tpu.memory_space<vmem>>, vector<1x16xf32>
    %480 = vector.broadcast %479 : vector<1x16xf32> to vector<10x16xf32>
    %481 = arith.addf %478, %480 : vector<10x16xf32>
    %c0_188 = arith.constant 0 : index
    %c0_189 = arith.constant 0 : index
    %c0_190 = arith.constant 0 : index
    %482 = vector.load %arg23[%c0_188, %c0_189, %c0_190] : memref<1x10x16xf32, #tpu.memory_space<vmem>>, vector<1x10x16xf32>
    %483 = vector.shape_cast %482 : vector<1x10x16xf32> to vector<10x16xf32>
    %484 = vector.shape_cast %481 : vector<10x16xf32> to vector<1x10x16xf32>
    tpu.vector_store %arg23[%c0_188, %c0_189, %c0_190], %484 {strides = array<i32>} : memref<1x10x16xf32, #tpu.memory_space<vmem>>, vector<1x10x16xf32>,
    return
  }
  func.func @transform_0(%arg0: i32) -> (i32, i32, i32) {
    %c0_i32 = arith.constant 0 : i32
    %c0_i32_0 = arith.constant 0 : i32
    %c0_i32_1 = arith.constant 0 : i32
    return %arg0, %c0_i32, %c0_i32_0 : i32, i32, i32
  }
  func.func @transform_1(%arg0: i32) -> (i32, i32, i32) {
    %c0_i32 = arith.constant 0 : i32
    %c0_i32_0 = arith.constant 0 : i32
    %c0_i32_1 = arith.constant 0 : i32
    return %arg0, %c0_i32, %c0_i32_0 : i32, i32, i32
  }
  func.func @transform_2(%arg0: i32) -> (i32, i32, i32) {
    %c0_i32 = arith.constant 0 : i32
    %c0_i32_0 = arith.constant 0 : i32
    %c0_i32_1 = arith.constant 0 : i32
    return %arg0, %c0_i32, %c0_i32_0 : i32, i32, i32
  }
  func.func @transform_3(%arg0: i32) -> (i32, i32) {
    %c0_i32 = arith.constant 0 : i32
    %c0_i32_0 = arith.constant 0 : i32
    %c0_i32_1 = arith.constant 0 : i32
    return %c0_i32, %c0_i32_0 : i32, i32
  }
  func.func @transform_4(%arg0: i32) -> (i32, i32) {
    %c0_i32 = arith.constant 0 : i32
    %c0_i32_0 = arith.constant 0 : i32
    %c0_i32_1 = arith.constant 0 : i32
    return %c0_i32, %c0_i32_0 : i32, i32
  }
  func.func @transform_5(%arg0: i32) -> (i32, i32) {
    %c0_i32 = arith.constant 0 : i32
    %c0_i32_0 = arith.constant 0 : i32
    %c0_i32_1 = arith.constant 0 : i32
    return %c0_i32, %c0_i32_0 : i32, i32
  }
  func.func @transform_6(%arg0: i32) -> (i32, i32) {
    %c0_i32 = arith.constant 0 : i32
    %c0_i32_0 = arith.constant 0 : i32
    %c0_i32_1 = arith.constant 0 : i32
    return %c0_i32, %c0_i32_0 : i32, i32
  }
  func.func @transform_7(%arg0: i32) -> (i32, i32) {
    %c0_i32 = arith.constant 0 : i32
    %c0_i32_0 = arith.constant 0 : i32
    %c0_i32_1 = arith.constant 0 : i32
    return %c0_i32, %c0_i32_0 : i32, i32
  }
  func.func @transform_8(%arg0: i32) -> (i32, i32) {
    %c0_i32 = arith.constant 0 : i32
    %c0_i32_0 = arith.constant 0 : i32
    %c0_i32_1 = arith.constant 0 : i32
    return %c0_i32, %c0_i32_0 : i32, i32
  }
  func.func @transform_9(%arg0: i32) -> (i32, i32) {
    %c0_i32 = arith.constant 0 : i32
    %c0_i32_0 = arith.constant 0 : i32
    %c0_i32_1 = arith.constant 0 : i32
    return %c0_i32, %c0_i32_0 : i32, i32
  }
  func.func @transform_10(%arg0: i32) -> (i32, i32, i32) {
    %c0_i32 = arith.constant 0 : i32
    %c0_i32_0 = arith.constant 0 : i32
    %c0_i32_1 = arith.constant 0 : i32
    %c0_i32_2 = arith.constant 0 : i32
    return %c0_i32, %c0_i32_0, %c0_i32_1 : i32, i32, i32
  }
  func.func @transform_11(%arg0: i32) -> (i32, i32, i32) {
    %c0_i32 = arith.constant 0 : i32
    %c0_i32_0 = arith.constant 0 : i32
    %c0_i32_1 = arith.constant 0 : i32
    %c0_i32_2 = arith.constant 0 : i32
    return %c0_i32, %c0_i32_0, %c0_i32_1 : i32, i32, i32
  }
  func.func @transform_12(%arg0: i32) -> (i32, i32, i32) {
    %c0_i32 = arith.constant 0 : i32
    %c0_i32_0 = arith.constant 0 : i32
    %c0_i32_1 = arith.constant 0 : i32
    %c0_i32_2 = arith.constant 0 : i32
    return %c0_i32, %c0_i32_0, %c0_i32_1 : i32, i32, i32
  }
  func.func @transform_13(%arg0: i32) -> (i32, i32, i32) {
    %c0_i32 = arith.constant 0 : i32
    %c0_i32_0 = arith.constant 0 : i32
    %c0_i32_1 = arith.constant 0 : i32
    %c0_i32_2 = arith.constant 0 : i32
    return %c0_i32, %c0_i32_0, %c0_i32_1 : i32, i32, i32
  }
  func.func @transform_14(%arg0: i32) -> (i32, i32, i32) {
    %c0_i32 = arith.constant 0 : i32
    %c0_i32_0 = arith.constant 0 : i32
    %c0_i32_1 = arith.constant 0 : i32
    %c0_i32_2 = arith.constant 0 : i32
    return %c0_i32, %c0_i32_0, %c0_i32_1 : i32, i32, i32
  }
  func.func @transform_15(%arg0: i32) -> (i32, i32, i32) {
    %c0_i32 = arith.constant 0 : i32
    %c0_i32_0 = arith.constant 0 : i32
    %c0_i32_1 = arith.constant 0 : i32
    %c0_i32_2 = arith.constant 0 : i32
    return %c0_i32, %c0_i32_0, %c0_i32_1 : i32, i32, i32
  }
  func.func @transform_16(%arg0: i32) -> (i32, i32, i32) {
    %c0_i32 = arith.constant 0 : i32
    %c0_i32_0 = arith.constant 0 : i32
    %c0_i32_1 = arith.constant 0 : i32
    %c0_i32_2 = arith.constant 0 : i32
    return %c0_i32, %c0_i32_0, %c0_i32_1 : i32, i32, i32
  }
  func.func @transform_17(%arg0: i32) -> (i32, i32, i32) {
    %c0_i32 = arith.constant 0 : i32
    %c0_i32_0 = arith.constant 0 : i32
    %c0_i32_1 = arith.constant 0 : i32
    %c0_i32_2 = arith.constant 0 : i32
    return %c0_i32, %c0_i32_0, %c0_i32_1 : i32, i32, i32
  }
  func.func @transform_18(%arg0: i32) -> (i32, i32, i32) {
    %c0_i32 = arith.constant 0 : i32
    %c0_i32_0 = arith.constant 0 : i32
    %c0_i32_1 = arith.constant 0 : i32
    %c0_i32_2 = arith.constant 0 : i32
    return %c0_i32, %c0_i32_0, %c0_i32_1 : i32, i32, i32
  }
  func.func @transform_19(%arg0: i32) -> (i32, i32, i32) {
    %c0_i32 = arith.constant 0 : i32
    %c0_i32_0 = arith.constant 0 : i32
    %c0_i32_1 = arith.constant 0 : i32
    %c0_i32_2 = arith.constant 0 : i32
    return %c0_i32, %c0_i32_0, %c0_i32_1 : i32, i32, i32
  }
  func.func @transform_20(%arg0: i32) -> (i32, i32, i32) {
    %c0_i32 = arith.constant 0 : i32
    %c0_i32_0 = arith.constant 0 : i32
    %c0_i32_1 = arith.constant 0 : i32
    %c0_i32_2 = arith.constant 0 : i32
    return %c0_i32, %c0_i32_0, %c0_i32_1 : i32, i32, i32
  }
  func.func @transform_21(%arg0: i32) -> (i32, i32, i32) {
    %c0_i32 = arith.constant 0 : i32
    %c0_i32_0 = arith.constant 0 : i32
    %c0_i32_1 = arith.constant 0 : i32
    %c0_i32_2 = arith.constant 0 : i32
    return %c0_i32, %c0_i32_0, %c0_i32_1 : i32, i32, i32
  }
  func.func @transform_22(%arg0: i32) -> (i32, i32, i32) {
    %c0_i32 = arith.constant 0 : i32
    %c0_i32_0 = arith.constant 0 : i32
    %c0_i32_1 = arith.constant 0 : i32
    return %arg0, %c0_i32, %c0_i32_0 : i32, i32, i32
  }
}

</mosaic_0001>

<bundles_post_ra>
// kernel: predictor_forward.1
= control target key start
LH: loop header
LB: loop body
LE: loop exit
PB: predicated region body
PF: predicated region fallthrough
CT: control target
= control target key end

     0   :  { %s4462_s0 = inlined_call_operand.vmem [shape: f32[2,10,16], index: 0, kind: input, shape index: {}]   ;;  %s4463_s1 = inlined_call_operand.vmem [shape: f32[2,10,1], index: 1, kind: input, shape index: {}]   ;;  %s4464_s2 = inlined_call_operand.vmem [shape: f32[2,1,10], index: 2, kind: input, shape index: {}]   ;;  %s4465_s3 = inlined_call_operand.vmem [shape: f32[8,32], index: 3, kind: input, shape index: {}]   ;;  %s4466_s4 = inlined_call_operand.vmem [shape: bf16[16,32], index: 4, kind: input, shape index: {}]   ;;  %s4467_s5 = inlined_call_operand.vmem [shape: f32[1,32], index: 5, kind: input, shape index: {}]   ;;  %s4468_s6 = inlined_call_operand.vmem [shape: bf16[32,16], index: 6, kind: input, shape index: {}]   ;;  %s4469_s7 = inlined_call_operand.vmem [shape: f32[1,16], index: 7, kind: input, shape index: {}]   ;;  %s4470_s8 = inlined_call_operand.vmem [shape: f32[1,32], index: 8, kind: input, shape index: {}]   ;;  %s4471_s9 = inlined_call_operand.vmem [shape: f32[1,32], index: 9, kind: input, shape index: {}]   ;;  %s4472_s10 = inlined_call_operand.vmem [shape: f32[2,1,32], index: 10, kind: input, shape index: {}]   ;;  %s4473_s11 = inlined_call_operand.vmem [shape: f32[2,1,32], index: 11, kind: input, shape index: {}]   ;;  %s4474_s12 = inlined_call_operand.vmem [shape: bf16[2,32,96], index: 12, kind: input, shape index: {}]   ;;  %s4475_s13 = inlined_call_operand.vmem [shape: f32[2,1,96], index: 13, kind: input, shape index: {}]   ;;  %s4476_s14 = inlined_call_operand.vmem [shape: bf16[2,32,32], index: 14, kind: input, shape index: {}]   ;;  %s4477_s15 = inlined_call_operand.vmem [shape: f32[2,1,32], index: 15, kind: input, shape index: {}]   ;;  %s4478_s16 = inlined_call_operand.vmem [shape: f32[2,1,32], index: 16, kind: input, shape index: {}]   ;;  %s4479_s17 = inlined_call_operand.vmem [shape: f32[2,1,32], index: 17, kind: input, shape index: {}]   ;;  %s4480_s18 = inlined_call_operand.vmem [shape: bf16[2,32,64], index: 18, kind: input, shape index: {}]   ;;  %s4481_s19 = inlined_call_operand.vmem [shape: f32[2,1,64], index: 19, kind: input, shape index: {}]   ;;  %s4482_s20 = inlined_call_operand.vmem [shape: bf16[2,64,32], index: 20, kind: input, shape index: {}]   ;;  %s4483_s21 = inlined_call_operand.vmem [shape: f32[2,1,32], index: 21, kind: input, shape index: {}]   ;;  %s4484_s22 = inlined_call_operand.vmem [shape: f32[2,10,16], index: 22, kind: output, shape index: {}]  }
   0x1   :  { %4492 = sst [smem:[#allocation2_spill]] %s4462_s0 }
   0x2   :  { %4493 = sst [smem:[#allocation3_spill]] %s4463_s1 }
   0x3   :  { %4494 = sst [smem:[#allocation4_spill]] %s4464_s2 }
   0x4   :  { %4495 = sst [smem:[#allocation5_spill]] %s4465_s3  ;;  %s3926_s3 = smov 0  }
   0x5   :  { %4496 = sst [smem:[#allocation6_spill]] %s4466_s4 }
   0x6   :  { %4497 = sst [smem:[#allocation7_spill]] %s4467_s5 }
   0x7   :  { %4498 = sst [smem:[#allocation8_spill]] %s4468_s6 }
   0x8 LB: > { %s3224_s28 = sadd.s32 4294967295, %s3795_s3   ;;  %p3228_p0 = scmp.ge.s32.totalorder %s3795_s3, 1  ;;  %s3795_s3 = sphi %s3926_s3, %s32_s3  }
   0x9   : > { %p630_p1 = scmp.lt.s32.totalorder %s3795_s3, 3 }
   0xb   : > { %p631_p2 = pnand %p3228_p0, %p630_p1 }
   0xc   : > { %p700_p3 = scmp.lt.s32.totalorder (!%p631_p2), %s3224_s28, 1  ;;  %v784_v0 = vlaneseq (!%p631_p2)  ;;  %v3797_v1 = vmov (!%p631_p2), 0.0   ;;  %vm3798_vm0 = vmmov (!%p631_p2), 0   ;;  %s4499_s0 = sld [smem:[#allocation3_spill]] (!%p631_p2)  ;;  %vm801_vm2 = vcmask (!%p631_p2), 1044480  }
   0xd   : > { %634 = sbr.rel (%p631_p2) target bundleno = 8559 (0x216f), region = 108  ;;  %3433 = vmatprep.subr.bf16.mxu1 (!%p631_p2), %v3797_v1  ;;  %3435 = vmatprep.mubr.msk.bf16.mxu1 (!%p631_p2), %vm3798_vm0, %v3797_v1  ;;  %vm797_vm4 = vcmask (!%p631_p2), 80896   ;;  %v3799_v12 = vmov (!%p631_p2), 0   ;;  %s4500_s24 = sld [smem:[#allocation6_spill]] (!%p631_p2)  ;;  %vm737_vm5 = vcmask (!%p631_p2), 130048   ;;  %vm876_vm6 = vcmask (!%p631_p2), 1043456  }
   0xe   : > { %v785_v2 = vshrl.u32 (!%p631_p2), %v784_v0, 7  ;;  %v788_v3 = vand.u32 (!%p631_p2), 127, %v784_v0  ;;  %3427 = vmatprep.subr.bf16.mxu0 (!%p631_p2), %v3797_v1  ;;  %3429 = vmatprep.mubr.msk.bf16.mxu0 (!%p631_p2), %vm3798_vm0, %v3797_v1  ;;  %s4501_s26 = sld [smem:[#allocation2_spill]] (!%p631_p2)  ;;  %s4502_s4 = sld [smem:[#allocation5_spill]] (!%p631_p2)  ;;  %vm872_vm11 = vcmask (!%p631_p2), 64512   ;;  %vm938_vm13 = vcmask (!%p631_p2), 261120  }
   0xf   : > { %3675 = vset.pattern.permute.xlu0 (!%p631_p2), %v3799_v12  ;;  %3676 = vset.pattern.permute.xlu1 (!%p631_p2), %v3799_v12  ;;  %s4503_s1 = sld [smem:[#allocation7_spill]] (!%p631_p2)  ;;  %vm942_vm14 = vcmask (!%p631_p2), 254976   ;;  %s3802_s5 = smov (!%p631_p2), 120  }
  0x10   : > { %v786_v4 = vadd.s32 (!%p631_p2), 8, %v785_v2  ;;  %vm789_vm1 = vcmp.le.s32.totalorder (!%p631_p2), %v788_v3, %v785_v2  ;;  %v848_v28 = vcvt.s32.f32 (!%p631_p2), %v788_v3  ;;  %v3678_v2 = vld [vmem:[%s4474_s12] sm:$0xff] (!%p631_p2)   ;;  %s4504_s25 = sld [smem:[#allocation4_spill]] (!%p631_p2)  ;;  %s4491_s27 = smov (!%p631_p2), 80  }
  0x11   : > { %v3238_v7 = vsel (!%p631_p2), %vm789_vm1, 1.0, %v3797_v1  ;;  %vm1118_vm1 = vcmask (!%p631_p2), 74752   ;;  %s4490_s30 = smov (!%p631_p2), 112  }
  0x12   : > { %vm790_vm3 = vcmp.le.s32.totalorder (!%p631_p2), %v788_v3, %v786_v4  ;;  %v3679_v3 = vld [vmem:[%s4474_s12 + $0x8] sm:$0xff] (!%p631_p2)  }
  0x13   : > { %v3239_v9 = vsel (!%p631_p2), %vm790_vm3, 1.0, %v3797_v1  ;;  %v3677_v13 = vld [vmem:[%s4500_s24] sm:$0xff] (!%p631_p2)   ;;  %s4486_s24 = smov (!%p631_p2), 40   ;;  %vm1928_vm3 = vcmask (!%p631_p2), 523264  }
  0x14   : > { %s4513_s28 = smov (!%p700_p3, %s3224_s28), 1  ;;  %v795_v11 = vpack.c.bf16 %v3239_v9, %v3238_v7  ;;  %3428 = vmatpush3.bf16.msra.mxu0 %v3677_v13  ;;  %v865_v23 = vld [vmem:[%s4502_s4] sm:$0xff]  ;;  %s4488_s4 = smov 48  }
  0x15   : > { %s3943_s29 = sshll.u32 %s4513_s28, 4  ;;  %3439 = vmatprep.subr.bf16.mxu0 %v3797_v1  ;;  %v871_v24 = vpack.c.bf16 %v865_v23, %v865_v23  ;;  %v3235_v43 = vld [vmem:[%s4503_s1] ss:$0 sm:$0xff]  ;;  %s3801_s1 = smov 96  }
  0x16   : > { %s709_s23 = scalar_lea.vmem %s4499_s0, %s3943_s29  ;;  %s704_s2 = scalar_lea.vmem %s4501_s26, %s3943_s29 }
  0x17   : > { %v782_v5 = vld [vmem:[%s709_s23] sm:$0xff]  ;;  %v783_v6 = vld [vmem:[%s709_s23 + $0x8] sm:$0x3]  ;;  %v878_v25 = vsel %vm876_vm6, %v871_v24, 0  ;;  %s3800_s23 = smov 88   ;;  %s4037_s26 = scalar_lea.vmem %s4504_s25, %s4513_s28 }
  0x18   : > { %v796_v8 = vpack.c.bf16 %v783_v6, %v782_v5  ;;  %v719_v17 = vld [vmem:[%s704_s2] sm:$0xff]  ;;  %v720_v18 = vld [vmem:[%s704_s2 + $0x8] sm:$0x3]  ;;  %vm921_vm7 = vcmp.gt.f32.partialorder %v782_v5, 0.5  ;;  %vm922_vm8 = vcmp.gt.f32.partialorder %v783_v6, 0.5  ;;  %s3803_s28 = smov 56  }
  0x19   : > { %v723_v20 = vpack.c.bf16 %v720_v18, %v719_v17  ;;  %v923_v26 = vsel %vm921_vm7, 1, %v3799_v12  ;;  %v924_v27 = vsel %vm922_vm8, 1, %v3799_v12  ;;  %v3246_v12 = vld [vmem:[%s4472_s10] ss:$0 sm:$0xff]  ;;  %s3804_s2 = smov 64   ;;  %s4489_s25 = smov 72  }
  0x1a   : > { %v803_v10 = vsel %vm801_vm2, %v796_v8, 0  ;;  %926 = vperm.xlu1 %3676, %v923_v26   ;;  %s4487_s0 = smov 104  }
  0x1b   : > { %3434 = vmatpush3.bf16.msra.mxu1 %v803_v10  ;;  %3430 = vmatmul.mubr.msk.bf16.vlgmr.msra.gmra.mrb[0].mxu0 %vm737_vm5, %v723_v20 }
  0x1c   : > { %3445 = vmatprep.subr.bf16.mxu1 %v3797_v1  ;;  %3441 = vmatprep.mubr.msk.bf16.mxu0 %vm3798_vm0, %v3797_v1 }
  0x1d   : > { %3440 = vmatpush3.bf16.msra.mxu0 %v878_v25 }
  0x1e   : > { %3436 = vmatmul.mubr.msk.bf16.vlgmr.msra.gmra.mrb[0].mxu1 %vm797_vm4, %v795_v11  ;;  %3453 = vmatprep.subr.bf16.mxu0 %v3797_v1 }
  0x1f   : > { %3449 = vmatprep.mubr.msk.bf16.mxu1 %vm3798_vm0, %v3797_v1  ;;  %929 = vperm.xlu1 %3676, %v924_v27  }
  0x20   : > { %3446 = vmatpush3.bf16.msra.mxu1 %v3678_v2 }
  0x21   : > { %3447 = vmatprep.subr.bf16.mxu1 %v3797_v1 }
  0x24   : > { %3448 = vmatpush3.bf16.msra.mxu1 %v3679_v3 }
  0x25   : > { %3459 = vmatprep.subr.bf16.mxu1 %v3797_v1 }
  0x99   : > { %v927_v42 = vpop.permute.xlu1 %926 }
  0x9a   : > { %vm931_vm12 = vcmp.eq.s32.totalorder %v927_v42, 1 }
  0x9e   : > { %v930_v45 = vpop.permute.xlu1 %929 }
  0x9f   : > { %vm932_vm15 = vcmp.eq.s32.totalorder %v930_v45, 1 }
  0xee   : > { %v775_v38 = vpop.f32.mrb[0].mxu0 }
  0xef   : > { %v3431_v39 = vpop.f32.mrb[1].mxu0  ;;  %v776_v44 = vadd.f32 %v3235_v43, %v775_v38 }
  0xf0   : > { %v778_v40 = vpop.f32.mrb[2].mxu0 }
  0xf1   : > { %v839_v14 = vpop.f32.mrb[0].mxu1  ;;  %v3432_v41 = vpop.f32.mrb[3].mxu0  ;;  %v779_v47 = vadd.f32 %v3235_v43, %v778_v40 }
  0xf2   : > { %v3241_v15 = vadd.f32 -1.0, %v839_v14  ;;  %v3437_v16 = vpop.f32.mrb[1].mxu1 }
  0xf3   : > { %v842_v19 = vpop.f32.mrb[2].mxu1  ;;  %v3247_v16 = vld [vmem:[%s4473_s11] ss:$0 sm:$0xff] }
  0xf4   : > { %851 = vperm.xlu0 %3675, %v3241_v15   ;;  %v3438_v21 = vpop.f32.mrb[3].mxu1  ;;  %v3242_v22 = vadd.f32 -1.0, %v842_v19 }
  0xf5   : > { %v3248_v21 = vld [vmem:[%s4475_s13] ss:$0 sm:$0xff] }
  0xf8   : > { %856 = vperm.xlu0 %3675, %v3242_v22  }
 0x173   : > { %v852_v29 = vpop.permute.xlu0 %851 }
 0x174   : > { %v859_v30 = vsub.f32 %v852_v29, %v848_v28 }
 0x176   : > { %v861_v31 = vand.u32 2147483647, %v859_v30 }
 0x177   : > { %v857_v32 = vpop.permute.xlu0 %856 }
 0x178   : > { %v860_v33 = vsub.f32 %v857_v32, %v848_v28  ;;  %vm863_vm9 = vcmp.lt.f32.partialorder %v861_v31, 0.5 }
 0x179   : > { %v3243_v35 = vsel %vm863_vm9, 1.0, %v3797_v1 }
 0x17a   : > { %v862_v34 = vand.u32 2147483647, %v860_v33 }
 0x17c   : > { %vm864_vm10 = vcmp.lt.f32.partialorder %v862_v34, 0.5 }
 0x17d   : > { %v3244_v36 = vsel %vm864_vm10, 1.0, %v3797_v1 }
 0x17e   : > { %v870_v37 = vpack.c.bf16 %v3244_v36, %v3243_v35 }
 0x180   : > { %3442 = vmatmul.mubr.msk.bf16.vlgmr.msra.gmra.mrb[4].mxu0 %vm872_vm11, %v870_v37  ;;  %v4040_v37 = vld [vmem:[%s4037_s26] ss:$0 sm:$0xff] }
 0x181   : > { %3455 = vmatprep.mubr.msk.bf16.mxu0 %vm3798_vm0, %v3797_v1 }
 0x253   : > { %v914_v46 = vpop.f32.mrb[4].mxu0 }
 0x254   : > { %v3980_v48 = vsel %vm931_vm12, %v914_v46, %v776_v44  ;;  %v3443_v49 = vpop.f32.mrb[5].mxu0 }
 0x255   : > { %v917_v50 = vpop.f32.mrb[6].mxu0  ;;  %v939_v51 = vsel %vm938_vm13, %v3980_v48, 0.0 }
 0x256   : > { %v3984_v52 = vsel %vm932_vm15, %v917_v50, %v779_v47  ;;  %940 = vadd.xlane.f32.xlu0 %v939_v51  ;;  %v3444_v53 = vpop.f32.mrb[7].mxu0 }
 0x257   : > { %v943_v54 = vsel %vm942_vm14, %v3984_v52, 0.0 }
 0x258   : > { %944 = vadd.xlane.f32.xlu1 %v943_v54 }
 0x2e3   : > { %v941_v55 = vpop.xlane.xlu0 %940 }
 0x2e4   : > { %v947_v56 = vmul.f32 0.03125, %v941_v55 }
 0x2e5   : > { %v945_v57 = vpop.xlane.xlu1 %944 }
 0x2e6   : > { %v949_v58 = vsub.f32 %v3980_v48, %v947_v56  ;;  %v948_v59 = vmul.f32 0.03125, %v945_v57 }
 0x2e8   : > { %v950_v60 = vsub.f32 %v3984_v52, %v948_v59  ;;  %v951_v61 = vmul.f32 %v949_v58, %v949_v58 }
 0x2ea   : > { %v953_v62 = vsel %vm938_vm13, %v951_v61, 0.0  ;;  %v952_v63 = vmul.f32 %v950_v60, %v950_v60 }
 0x2eb   : > { %954 = vadd.xlane.f32.xlu0 %v953_v62 }
 0x2ec   : > { %v956_v0 = vsel %vm942_vm14, %v952_v63, 0.0 }
 0x2ef   : > { %957 = vadd.xlane.f32.xlu0 %v956_v0 }
 0x378   : > { %v955_v4 = vpop.xlane.xlu0 %954 }
 0x379   : > { %v959_v5 = vmul.f32 0.03125, %v955_v4 }
 0x37b   : > { %v961_v6 = vadd.f32 1e-05, %v959_v5 }
 0x37c   : > { %v958_v7 = vpop.xlane.xlu0 %957 }
 0x37d   : > { %3696 = vrsqrt.f32 %v961_v6  ;;  %v960_v8 = vmul.f32 0.03125, %v958_v7 }
 0x37f   : > { %v962_v9 = vadd.f32 1e-05, %v960_v8 }
 0x381   : > { %3698 = vrsqrt.f32 %v962_v9 }
 0x387   : > { %v3697_v10 = vpop.eup %3696 }
 0x388   : > { %v965_v11 = vmul.f32 %v3697_v10, %v949_v58 }
 0x38a   : > { %v973_v14 = vmul.f32 %v3246_v12, %v965_v11 }
 0x38b   : > { %v3699_v13 = vpop.eup %3698 }
 0x38c   : > { %v966_v15 = vmul.f32 %v3699_v13, %v950_v60  ;;  %v981_v18 = vadd.f32 %v3247_v16, %v973_v14 }
 0x38e   : > { %v974_v17 = vmul.f32 %v3246_v12, %v966_v15 }
 0x390   : > { %v982_v19 = vadd.f32 %v3247_v16, %v974_v17 }
 0x392   : > { %v987_v20 = vpack.c.bf16 %v982_v19, %v981_v18 }
 0x394   : > { %3450 = vmatmul.mubr.msk.bf16.vlgmr.msra.gmra.mrb[4].mxu1 %vm938_vm13, %v987_v20 }
 0x395   : > { %3461 = vmatprep.mubr.msk.bf16.mxu1 %vm3798_vm0, %v3797_v1 }
 0x467   : > { %v1044_v22 = vpop.f32.mrb[4].mxu1 }
 0x468   : > { %v1045_v23 = vadd.f32 %v3248_v21, %v1044_v22  ;;  %v3451_v24 = vpop.f32.mrb[5].mxu1 }
 0x469   : > { %v1047_v25 = vpop.f32.mrb[6].mxu1 }
 0x46a   : > { %v1048_v26 = vadd.f32 %v3248_v21, %v1047_v25  ;;  %v3452_v27 = vpop.f32.mrb[7].mxu1  ;;  %v1055_v28 = vmul.f32 0.35355338, %v1045_v23 }
 0x46c   : > { %v1056_v29 = vmul.f32 0.35355338, %v1048_v26  ;;  %v4012_v30 = vpack.c.bf16 %v1048_v26, %v1045_v23 }
 0x46e   : > { %v4014_v31 = vpack.c.bf16 %v1056_v29, %v1055_v28  ;;  %1192 = vrot.lane.b32.xlu0 %v4012_v30, %s3800_s23  ;;  %1066 = vrot.lane.b32.xlu1 %v4012_v30, %s3801_s1 }
 0x472   : > { %1190 = vrot.lane.b32.xlu1 %v4014_v31, %s3802_s5 }
 0x4e0   : > { %v1067_v32 = vpop.permute.xlu1 %1066  ;;  %v1193_v34 = vpop.permute.xlu0 %1192 }
 0x4e1   : > { %v1072_v33 = vsel %vm872_vm11, %v1067_v32, 0  ;;  %v1198_v35 = vsel %vm872_vm11, %v1193_v34, 0 }
 0x4e2   : > { %3454 = vmatpush3.bf16.xpose.msra.mxu0 %v1072_v33  ;;  %v1051_v33 = vld [vmem:[%s4476_s14] sm:$0xf] }
 0x4e3   : > { %3465 = vmatprep.subr.bf16.mxu0 %v3797_v1  ;;  %v1365_v34 = vsel %vm876_vm6, %v1051_v33, 0 }
 0x4e4   : > { %v1191_v36 = vpop.permute.xlu1 %1190 }
 0x4e9   : > { %3456 = vmatmul.mubr.msk.bf16.vlgmr.msra.gmra.mrb[8].mxu0 %vm872_vm11, %v4014_v31 }
 0x4ea   : > { %3466 = vmatpush3.bf16.xpose.msra.mxu0 %v1198_v35  ;;  %3467 = vmatprep.mubr.msk.bf16.mxu0 %vm3798_vm0, %v3797_v1  ;;  %v1052_v35 = vld [vmem:[%s4476_s14 + $0x4] sm:$0xf] }
 0x4eb   : > { %3477 = vmatprep.subr.bf16.mxu0 %v3797_v1 }
 0x4f1   : > { %3468 = vmatmul.mubr.msk.bf16.vlgmr.msra.gmra.mrb[12].mxu0 %vm872_vm11, %v1191_v36  ;;  %v1318_v36 = vsel %vm876_vm6, %v1052_v35, 0 }
 0x4f2   : > { %3479 = vmatprep.mubr.msk.bf16.mxu0 %vm3798_vm0, %v3797_v1  ;;  %3478 = vmatpush3.bf16.msra.mxu0 %v1318_v36 }
 0x4f3   : > { %3489 = vmatprep.subr.bf16.mxu0 %v3797_v1 }
 0x5bc   : > { %v1108_v38 = vpop.f32.mrb[8].mxu0 }
 0x5bd   : > { %v1109_v39 = vadd.f32 %v4040_v37, %v1108_v38  ;;  %v3457_v40 = vpop.f32.mrb[9].mxu0 }
 0x5be   : > { %v1111_v41 = vpop.f32.mrb[10].mxu0 }
 0x5bf   : > { %v1112_v42 = vadd.f32 %v4040_v37, %v1111_v41  ;;  %v3458_v43 = vpop.f32.mrb[11].mxu0  ;;  %v1115_v44 = vsel %vm797_vm4, %v1109_v39, -inf }
 0x5c0   : > { %1116 = vmax.xlane.f32.xlu1 %v1115_v44 }
 0x5c1   : > { %v1119_v45 = vsel %vm1118_vm1, %v1112_v42, -inf }
 0x5c2   : > { %1120 = vmax.xlane.f32.xlu0 %v1119_v45 }
 0x5c4   : > { %v1234_v46 = vpop.f32.mrb[12].mxu0 }
 0x5c5   : > { %v1235_v47 = vadd.f32 %v4040_v37, %v1234_v46  ;;  %v3469_v49 = vpop.f32.mrb[13].mxu0 }
 0x5c6   : > { %v1237_v50 = vpop.f32.mrb[14].mxu0 }
 0x5c7   : > { %v1238_v51 = vadd.f32 %v4040_v37, %v1237_v50  ;;  %v3470_v53 = vpop.f32.mrb[15].mxu0  ;;  %v1241_v54 = vsel %vm797_vm4, %v1235_v47, -inf }
 0x5c8   : > { %1242 = vmax.xlane.f32.xlu0 %v1241_v54 }
 0x5c9   : > { %v1244_v55 = vsel %vm1118_vm1, %v1238_v51, -inf }
 0x5ca   : > { %1245 = vmax.xlane.f32.xlu1 %v1244_v55 }
 0x64d   : > { %v1117_v56 = vpop.xlane.xlu1 %1116 }
 0x64e   : > { %v1122_v57 = vsub.f32 %v1109_v39, %v1117_v56 }
 0x64f   : > { %v1121_v58 = vpop.xlane.xlu0 %1120 }
 0x650   : > { %v1124_v59 = vmul.f32 1.442695, %v1122_v57  ;;  %v1123_v60 = vsub.f32 %v1112_v42, %v1121_v58 }
 0x652   : > { %3700 = vpow2.f32 %v1124_v59  ;;  %v1126_v61 = vmul.f32 1.442695, %v1123_v60 }
 0x654   : > { %3702 = vpow2.f32 %v1126_v61 }
 0x655   : > { %v1243_v62 = vpop.xlane.xlu0 %1242 }
 0x656   : > { %v1247_v63 = vsub.f32 %v1235_v47, %v1243_v62 }
 0x657   : > { %v1246_v0 = vpop.xlane.xlu1 %1245 }
 0x658   : > { %v1249_v2 = vmul.f32 1.442695, %v1247_v63  ;;  %v1248_v3 = vsub.f32 %v1238_v51, %v1246_v0 }
 0x65a   : > { %3704 = vpow2.f32 %v1249_v2  ;;  %v1251_v4 = vmul.f32 1.442695, %v1248_v3 }
 0x65c   : > { %v3701_v5 = vpop.eup %3700  ;;  %3706 = vpow2.f32 %v1251_v4 }
 0x65d   : > { %v1128_v6 = vsel %vm797_vm4, %v3701_v5, 0.0 }
 0x65e   : > { %v3703_v7 = vpop.eup %3702  ;;  %1129 = vadd.xlane.f32.xlu0 %v1128_v6 }
 0x65f   : > { %v1131_v8 = vsel %vm1118_vm1, %v3703_v7, 0.0 }
 0x660   : > { %1132 = vadd.xlane.f32.xlu1 %v1131_v8 }
 0x664   : > { %v3705_v9 = vpop.eup %3704 }
 0x665   : > { %v1253_v10 = vsel %vm797_vm4, %v3705_v9, 0.0 }
 0x666   : > { %v3707_v11 = vpop.eup %3706  ;;  %1254 = vadd.xlane.f32.xlu0 %v1253_v10 }
 0x667   : > { %v1256_v12 = vsel %vm1118_vm1, %v3707_v11, 0.0 }
 0x668   : > { %1257 = vadd.xlane.f32.xlu1 %v1256_v12 }
 0x679   : > { %1264 = vrot.lane.b32.xlu1 %v4012_v30, %s3803_s28 }
 0x67c   : > { %1139 = vrot.lane.b32.xlu0 %v4012_v30, %s3804_s2 }
 0x67d   : > { %1410 = vrot.lane.b32.xlu1 %v4012_v30, %s4491_s27  ;;  %s4509_s27 = smov 104  }
 0x680   : > { %1408 = vrot.lane.b32.xlu0 %v4014_v31, %s4490_s30  ;;  %s4511_s30 = sld [smem:[#allocation8_spill]] }
 0x6eb   : > { %v1130_v13 = vpop.xlane.xlu0 %1129 }
 0x6ec   : > { %3708 = vrcp.f32 %v1130_v13 }
 0x6ed   : > { %v1133_v14 = vpop.xlane.xlu1 %1132 }
 0x6ee   : > { %3710 = vrcp.f32 %v1133_v14 }
 0x6f3   : > { %v1255_v15 = vpop.xlane.xlu0 %1254 }
 0x6f4   : > { %3712 = vrcp.f32 %v1255_v15 }
 0x6f5   : > { %v1258_v16 = vpop.xlane.xlu1 %1257 }
 0x6f6   : > { %v3709_v17 = vpop.eup %3708  ;;  %3714 = vrcp.f32 %v1258_v16 }
 0x6f7   : > { %v1140_v18 = vpop.permute.xlu0 %1139  ;;  %v1136_v21 = vmul.f32 %v3709_v17, %v3701_v5 }
 0x6f8   : > { %v3711_v19 = vpop.eup %3710  ;;  %v1145_v20 = vsel %vm801_vm2, %v1140_v18, 0 }
 0x6f9   : > { %v1137_v22 = vmul.f32 %v3711_v19, %v3703_v7  ;;  %3460 = vmatpush3.bf16.msra.mxu1 %v1145_v20  ;;  %v1265_v23 = vpop.permute.xlu1 %1264 }
 0x6fa   : > { %3471 = vmatprep.subr.bf16.mxu1 %v3797_v1  ;;  %v1270_v25 = vsel %vm801_vm2, %v1265_v23, 0 }
 0x6fb   : > { %v1138_v24 = vpack.c.bf16 %v1137_v22, %v1136_v21  ;;  %v1409_v51 = vpop.permute.xlu0 %1408 }
 0x6fd   : > { %3462 = vmatmul.mubr.msk.bf16.vlgmr.msra.gmra.mrb[8].mxu1 %vm797_vm4, %v1138_v24  ;;  %v1411_v45 = vpop.permute.xlu1 %1410 }
 0x6fe   : > { %v3713_v26 = vpop.eup %3712  ;;  %3472 = vmatpush3.bf16.msra.mxu1 %v1270_v25  ;;  %3473 = vmatprep.mubr.msk.bf16.mxu1 %vm3798_vm0, %v3797_v1  ;;  %v1416_v50 = vsel %vm872_vm11, %v1411_v45, 0 }
 0x6ff   : > { %3483 = vmatprep.subr.bf16.mxu1 %v3797_v1  ;;  %v1261_v28 = vmul.f32 %v3713_v26, %v3705_v9 }
 0x700   : > { %v3715_v27 = vpop.eup %3714 }
 0x701   : > { %v1262_v29 = vmul.f32 %v3715_v27, %v3707_v11 }
 0x703   : > { %v1263_v32 = vpack.c.bf16 %v1262_v29, %v1261_v28  ;;  %v1053_v29 = vld [vmem:[%s4476_s14 + $0x8] sm:$0xf] }
 0x705   : > { %3474 = vmatmul.mubr.msk.bf16.vlgmr.msra.gmra.mrb[12].mxu1 %vm797_vm4, %v1263_v32  ;;  %v1536_v32 = vsel %vm876_vm6, %v1053_v29, 0 }
 0x706   : > { %3485 = vmatprep.mubr.msk.bf16.mxu1 %vm3798_vm0, %v3797_v1  ;;  %3484 = vmatpush3.bf16.msra.mxu1 %v1365_v34 }
 0x707   : > { %3495 = vmatprep.subr.bf16.mxu1 %v3797_v1 }
 0x7d0   : > { %v1181_v38 = vpop.f32.mrb[8].mxu1 }
 0x7d1   : > { %v3463_v39 = vpop.f32.mrb[9].mxu1 }
 0x7d2   : > { %v1184_v40 = vpop.f32.mrb[10].mxu1 }
 0x7d3   : > { %v1188_v41 = vpack.c.bf16 %v1184_v40, %v1181_v38  ;;  %v3464_v42 = vpop.f32.mrb[11].mxu1 }
 0x7d5   : > { %3486 = vmatmul.mubr.msk.bf16.vlgmr.msra.gmra.mrb[16].mxu1 %vm872_vm11, %v1188_v41 }
 0x7d6   : > { %3497 = vmatprep.mubr.msk.bf16.mxu1 %vm3798_vm0, %v3797_v1 }
 0x7d8   : > { %v1306_v43 = vpop.f32.mrb[12].mxu1 }
 0x7d9   : > { %v3475_v44 = vpop.f32.mrb[13].mxu1 }
 0x7da   : > { %v1309_v46 = vpop.f32.mrb[14].mxu1 }
 0x7db   : > { %v1313_v47 = vpack.c.bf16 %v1309_v46, %v1306_v43  ;;  %v3476_v49 = vpop.f32.mrb[15].mxu1 }
 0x7dd   : > { %3480 = vmatmul.mubr.msk.bf16.vlgmr.msra.gmra.mrb[16].mxu0 %vm872_vm11, %v1313_v47 }
 0x7de   : > { %3490 = vmatpush3.bf16.xpose.msra.mxu0 %v1416_v50  ;;  %3491 = vmatprep.mubr.msk.bf16.mxu0 %vm3798_vm0, %v3797_v1 }
 0x7df   : > { %3501 = vmatprep.subr.bf16.mxu0 %v3797_v1 }
 0x7e5   : > { %3492 = vmatmul.mubr.msk.bf16.vlgmr.msra.gmra.mrb[20].mxu0 %vm872_vm11, %v1409_v51 }
 0x7e6   : > { %3503 = vmatprep.mubr.msk.bf16.mxu0 %vm3798_vm0, %v3797_v1  ;;  %3502 = vmatpush3.bf16.msra.mxu0 %v1536_v32 }
 0x7e7   : > { %3513 = vmatprep.subr.bf16.mxu0 %v3797_v1 }
 0x8a8   : > { %v1401_v53 = vpop.f32.mrb[16].mxu1 }
 0x8a9   : > { %v3487_v54 = vpop.f32.mrb[17].mxu1 }
 0x8aa   : > { %v1404_v55 = vpop.f32.mrb[18].mxu1 }
 0x8ab   : > { %v3488_v56 = vpop.f32.mrb[19].mxu1 }
 0x8b0   : > { %v1354_v57 = vpop.f32.mrb[16].mxu0 }
 0x8b1   : > { %v4093_v58 = vadd.f32 %v1401_v53, %v1354_v57  ;;  %v3481_v59 = vpop.f32.mrb[17].mxu0 }
 0x8b2   : > { %v1357_v60 = vpop.f32.mrb[18].mxu0 }
 0x8b3   : > { %v4095_v61 = vadd.f32 %v1404_v55, %v1357_v60  ;;  %v3482_v62 = vpop.f32.mrb[19].mxu0 }
 0x8b8   : > { %v1452_v63 = vpop.f32.mrb[20].mxu0 }
 0x8b9   : > { %v1453_v0 = vadd.f32 %v4040_v37, %v1452_v63  ;;  %v3493_v2 = vpop.f32.mrb[21].mxu0 }
 0x8ba   : > { %v1455_v3 = vpop.f32.mrb[22].mxu0 }
 0x8bb   : > { %v1456_v4 = vadd.f32 %v4040_v37, %v1455_v3  ;;  %v3494_v5 = vpop.f32.mrb[23].mxu0  ;;  %v1459_v6 = vsel %vm797_vm4, %v1453_v0, -inf }
 0x8bc   : > { %1460 = vmax.xlane.f32.xlu1 %v1459_v6 }
 0x8bd   : > { %v1462_v7 = vsel %vm1118_vm1, %v1456_v4, -inf }
 0x8be   : > { %1463 = vmax.xlane.f32.xlu0 %v1462_v7 }
 0x949   : > { %v1461_v8 = vpop.xlane.xlu1 %1460 }
 0x94a   : > { %v1465_v9 = vsub.f32 %v1453_v0, %v1461_v8 }
 0x94b   : > { %v1464_v10 = vpop.xlane.xlu0 %1463 }
 0x94c   : > { %v1467_v11 = vmul.f32 1.442695, %v1465_v9  ;;  %v1466_v12 = vsub.f32 %v1456_v4, %v1464_v10 }
 0x94e   : > { %3716 = vpow2.f32 %v1467_v11  ;;  %v1469_v13 = vmul.f32 1.442695, %v1466_v12 }
 0x950   : > { %3718 = vpow2.f32 %v1469_v13 }
 0x958   : > { %v3717_v14 = vpop.eup %3716 }
 0x959   : > { %v1471_v15 = vsel %vm797_vm4, %v3717_v14, 0.0 }
 0x95a   : > { %v3719_v16 = vpop.eup %3718  ;;  %1472 = vadd.xlane.f32.xlu0 %v1471_v15 }
 0x95b   : > { %v1474_v17 = vsel %vm1118_vm1, %v3719_v16, 0.0 }
 0x95c   : > { %1475 = vadd.xlane.f32.xlu1 %v1474_v17 }
 0x96d   : > { %1583 = vrot.lane.b32.xlu1 %v4012_v30, %s4489_s25 }
 0x970   : > { %1482 = vrot.lane.b32.xlu0 %v4012_v30, %s4488_s4  ;;  %s717_s4 = scalar_lea.vmem %s4484_s22, %s3943_s29 }
 0x971   : > { %1581 = vrot.lane.b32.xlu1 %v4014_v31, %s4487_s0  ;;  %s4510_s0 = smov 40  }
 0x9e7   : > { %v1473_v18 = vpop.xlane.xlu0 %1472 }
 0x9e8   : > { %3720 = vrcp.f32 %v1473_v18 }
 0x9e9   : > { %v1476_v19 = vpop.xlane.xlu1 %1475 }
 0x9ea   : > { %3722 = vrcp.f32 %v1476_v19 }
 0x9eb   : > { %v1483_v20 = vpop.permute.xlu0 %1482 }
 0x9ec   : > { %v1488_v21 = vsel %vm801_vm2, %v1483_v20, 0  ;;  %v3265_v20 = vld [vmem:[%s4477_s15] ss:$0 sm:$0xff] }
 0x9ed   : > { %3496 = vmatpush3.bf16.msra.mxu1 %v1488_v21  ;;  %v1584_v26 = vpop.permute.xlu1 %1583 }
 0x9ee   : > { %3507 = vmatprep.subr.bf16.mxu1 %v3797_v1  ;;  %v1589_v28 = vsel %vm872_vm11, %v1584_v26, 0 }
 0x9f1   : > { %v1582_v31 = vpop.permute.xlu1 %1581 }
 0x9f2   : > { %v3721_v22 = vpop.eup %3720 }
 0x9f3   : > { %v1479_v24 = vmul.f32 %v3721_v22, %v3717_v14 }
 0x9f4   : > { %v3723_v23 = vpop.eup %3722 }
 0x9f5   : > { %v1480_v25 = vmul.f32 %v3723_v23, %v3719_v16 }
 0x9f7   : > { %v1481_v27 = vpack.c.bf16 %v1480_v25, %v1479_v24 }
 0x9f9   : > { %3498 = vmatmul.mubr.msk.bf16.vlgmr.msra.gmra.mrb[20].mxu1 %vm797_vm4, %v1481_v27 }
 0x9fa   : > { %3508 = vmatpush3.bf16.xpose.msra.mxu1 %v1589_v28  ;;  %3509 = vmatprep.mubr.msk.bf16.mxu1 %vm3798_vm0, %v3797_v1 }
 0x9fb   : > { %3519 = vmatprep.subr.bf16.mxu1 %v3797_v1 }
 0xa01   : > { %3510 = vmatmul.mubr.msk.bf16.vlgmr.msra.gmra.mrb[24].mxu1 %vm872_vm11, %v1582_v31 }
 0xa02   : > { %3521 = vmatprep.mubr.msk.bf16.mxu1 %vm3798_vm0, %v3797_v1 }
 0xacc   : > { %v1524_v33 = vpop.f32.mrb[20].mxu1 }
 0xacd   : > { %v3499_v34 = vpop.f32.mrb[21].mxu1 }
 0xace   : > { %v1527_v35 = vpop.f32.mrb[22].mxu1 }
 0xacf   : > { %v1531_v36 = vpack.c.bf16 %v1527_v35, %v1524_v33  ;;  %v3500_v38 = vpop.f32.mrb[23].mxu1 }
 0xad1   : > { %3504 = vmatmul.mubr.msk.bf16.vlgmr.msra.gmra.mrb[24].mxu0 %vm872_vm11, %v1531_v36 }
 0xad2   : > { %3515 = vmatprep.mubr.msk.bf16.mxu0 %vm3798_vm0, %v3797_v1 }
 0xad4   : > { %v1625_v39 = vpop.f32.mrb[24].mxu1 }
 0xad5   : > { %v1626_v40 = vadd.f32 %v4040_v37, %v1625_v39  ;;  %v3511_v41 = vpop.f32.mrb[25].mxu1 }
 0xad6   : > { %v1628_v42 = vpop.f32.mrb[26].mxu1  ;;  %v3681_v41 = vld [vmem:[%s4480_s18 + $0x8] sm:$0xff]  }
 0xad7   : > { %v1629_v43 = vadd.f32 %v4040_v37, %v1628_v42  ;;  %v3512_v44 = vpop.f32.mrb[27].mxu1  ;;  %v1632_v45 = vsel %vm797_vm4, %v1626_v40, -inf }
 0xad8   : > { %1633 = vmax.xlane.f32.xlu0 %v1632_v45 }
 0xad9   : > { %v1635_v46 = vsel %vm1118_vm1, %v1629_v43, -inf }
 0xada   : > { %1636 = vmax.xlane.f32.xlu1 %v1635_v46 }
 0xaeb   : > { %1655 = vrot.lane.b32.xlu1 %v4012_v30, %s4486_s24  ;;  %s4508_s24 = smov 48  }
 0xb65   : > { %v1634_v47 = vpop.xlane.xlu0 %1633 }
 0xb66   : > { %v1638_v49 = vsub.f32 %v1626_v40, %v1634_v47  ;;  %v3680_v40 = vld [vmem:[%s4480_s18] sm:$0xff]  }
 0xb67   : > { %v1637_v50 = vpop.xlane.xlu1 %1636 }
 0xb68   : > { %v1640_v51 = vmul.f32 1.442695, %v1638_v49  ;;  %v1639_v53 = vsub.f32 %v1629_v43, %v1637_v50 }
 0xb6a   : > { %3724 = vpow2.f32 %v1640_v51  ;;  %v1642_v54 = vmul.f32 1.442695, %v1639_v53  ;;  %v3266_v51 = vld [vmem:[%s4478_s16] ss:$0 sm:$0xff] }
 0xb6b   : > { %v1656_v55 = vpop.permute.xlu1 %1655 }
 0xb6c   : > { %3726 = vpow2.f32 %v1642_v54  ;;  %v1661_v56 = vsel %vm801_vm2, %v1656_v55, 0 }
 0xb6d   : > { %3514 = vmatpush3.bf16.msra.mxu0 %v1661_v56  ;;  %v3267_v56 = vld [vmem:[%s4479_s17] ss:$0 sm:$0xff] }
 0xb6e   : > { %3525 = vmatprep.subr.bf16.mxu0 %v3797_v1 }
 0xb74   : > { %v3725_v57 = vpop.eup %3724 }
 0xb75   : > { %v1644_v59 = vsel %vm797_vm4, %v3725_v57, 0.0 }
 0xb76   : > { %v3727_v60 = vpop.eup %3726  ;;  %1645 = vadd.xlane.f32.xlu0 %v1644_v59 }
 0xb77   : > { %v1647_v30 = vsel %vm1118_vm1, %v3727_v60, 0.0 }
 0xb7a   : > { %1648 = vadd.xlane.f32.xlu0 %v1647_v30 }
 0xba4   : > { %v1572_v62 = vpop.f32.mrb[24].mxu0 }
 0xba5   : > { %v1579_v63 = vadd.f32 %v1572_v62, %v4093_v58  ;;  %v3505_v0 = vpop.f32.mrb[25].mxu0  ;;  %v1054_v58 = vld [vmem:[%s4476_s14 + $0xc] sm:$0xf]  ;;  %v3682_v62 = vld [vmem:[%s4482_s20] sm:$0xff]  }
 0xba6   : > { %v1575_v2 = vpop.f32.mrb[26].mxu0  ;;  %v3684_v0 = vld [vmem:[%s4482_s20 + $0x10] sm:$0xff]  }
 0xba7   : > { %v1580_v3 = vadd.f32 %v1575_v2, %v4095_v61  ;;  %v3506_v4 = vpop.f32.mrb[27].mxu0  ;;  %v1709_v61 = vsel %vm876_vm6, %v1054_v58, 0  ;;  %v3685_v2 = vld [vmem:[%s4482_s20 + $0x18] sm:$0xff]  }
 0xba8   : > { %3520 = vmatpush3.bf16.msra.mxu1 %v1709_v61 }
 0xba9   : > { %3533 = vmatprep.subr.bf16.mxu1 %v3797_v1 }
 0xc03   : > { %v1646_v5 = vpop.xlane.xlu0 %1645 }
 0xc04   : > { %3728 = vrcp.f32 %v1646_v5 }
 0xc07   : > { %v1649_v6 = vpop.xlane.xlu0 %1648 }
 0xc08   : > { %3730 = vrcp.f32 %v1649_v6 }
 0xc0e   : > { %v3729_v7 = vpop.eup %3728 }
 0xc0f   : > { %v1652_v9 = vmul.f32 %v3729_v7, %v3725_v57 }
 0xc12   : > { %v3731_v8 = vpop.eup %3730 }
 0xc13   : > { %v1653_v10 = vmul.f32 %v3731_v8, %v3727_v60 }
 0xc15   : > { %v1654_v11 = vpack.c.bf16 %v1653_v10, %v1652_v9 }
 0xc17   : > { %3516 = vmatmul.mubr.msk.bf16.vlgmr.msra.gmra.mrb[28].mxu0 %vm797_vm4, %v1654_v11 }
 0xc18   : > { %3529 = vmatprep.mubr.msk.bf16.mxu0 %vm3798_vm0, %v3797_v1  ;;  %3526 = vmatpush3.bf16.msra.mxu0 %v3680_v40 }
 0xc19   : > { %3527 = vmatprep.subr.bf16.mxu0 %v3797_v1 }
 0xc1c   : > { %3528 = vmatpush3.bf16.msra.mxu0 %v3681_v41 }
 0xc1d   : > { %3545 = vmatprep.subr.bf16.mxu0 %v3797_v1 }
 0xcea   : > { %v1697_v12 = vpop.f32.mrb[28].mxu0 }
 0xceb   : > { %v3517_v13 = vpop.f32.mrb[29].mxu0 }
 0xcec   : > { %v1700_v14 = vpop.f32.mrb[30].mxu0 }
 0xced   : > { %v1704_v15 = vpack.c.bf16 %v1700_v14, %v1697_v12  ;;  %v3518_v16 = vpop.f32.mrb[31].mxu0 }
 0xcef   : > { %3522 = vmatmul.mubr.msk.bf16.vlgmr.msra.gmra.mrb[28].mxu1 %vm872_vm11, %v1704_v15 }
 0xcf0   : > { %3541 = vmatprep.mubr.msk.bf16.mxu1 %vm3798_vm0, %v3797_v1  ;;  %3534 = vmatpush3.bf16.msra.mxu1 %v3682_v62 }
 0xcf1   : > { %3535 = vmatprep.subr.bf16.mxu1 %v3797_v1 }
 0xdc2   : > { %v1745_v17 = vpop.f32.mrb[28].mxu1 }
 0xdc3   : > { %v1752_v18 = vadd.f32 %v1745_v17, %v1579_v63  ;;  %v3523_v19 = vpop.f32.mrb[29].mxu1  ;;  %v3683_v63 = vld [vmem:[%s4482_s20 + $0x8] sm:$0xff]  }
 0xdc4   : > { %v1748_v21 = vpop.f32.mrb[30].mxu1  ;;  %3536 = vmatpush3.bf16.msra.mxu1 %v3683_v63 }
 0xdc5   : > { %v1754_v22 = vadd.f32 %v1752_v18, %v3980_v48  ;;  %v1753_v23 = vadd.f32 %v1748_v21, %v1580_v3  ;;  %v3524_v24 = vpop.f32.mrb[31].mxu1  ;;  %3537 = vmatprep.subr.bf16.mxu1 %v3797_v1  ;;  %v3268_v3 = vld [vmem:[%s4481_s19] ss:$0 sm:$0xff] }
 0xdc7   : > { %v4154_v25 = vadd.f32 %v3265_v20, %v1754_v22  ;;  %v1755_v26 = vadd.f32 %v1753_v23, %v3984_v52 }
 0xdc8   : > { %3538 = vmatpush3.bf16.msra.mxu1 %v3684_v0 }
 0xdc9   : > { %v4157_v27 = vadd.f32 %v3265_v20, %v1755_v26  ;;  %v1767_v28 = vsel %vm938_vm13, %v4154_v25, 0.0  ;;  %3539 = vmatprep.subr.bf16.mxu1 %v3797_v1 }
 0xdca   : > { %1768 = vadd.xlane.f32.xlu0 %v1767_v28 }
 0xdcb   : > { %v1770_v31 = vsel %vm942_vm14, %v4157_v27, 0.0 }
 0xdcc   : > { %3540 = vmatpush3.bf16.msra.mxu1 %v3685_v2  ;;  %v3281_v2 = vld [vmem:[%s4473_s11 + $0x1] ss:$0 sm:$0xff] }
 0xdcd   : > { %3559 = vmatprep.subr.bf16.mxu1 %v3797_v1 }
 0xdce   : > { %1771 = vadd.xlane.f32.xlu0 %v1770_v31 }
 0xe57   : > { %v1769_v29 = vpop.xlane.xlu0 %1768 }
 0xe58   : > { %v1773_v32 = vmul.f32 0.03125, %v1769_v29  ;;  %v3277_v29 = vld [vmem:[%s4483_s21] ss:$0 sm:$0xff] }
 0xe5a   : > { %v1775_v48 = vsub.f32 %v4154_v25, %v1773_v32 }
 0xe5b   : > { %v1772_v33 = vpop.xlane.xlu0 %1771 }
 0xe5c   : > { %v1774_v34 = vmul.f32 0.03125, %v1772_v33  ;;  %v1777_v35 = vmul.f32 %v1775_v48, %v1775_v48 }
 0xe5e   : > { %v1776_v36 = vsub.f32 %v4157_v27, %v1774_v34  ;;  %v1779_v52 = vsel %vm938_vm13, %v1777_v35, 0.0 }
 0xe5f   : > { %1780 = vadd.xlane.f32.xlu0 %v1779_v52 }
 0xe60   : > { %v1778_v38 = vmul.f32 %v1776_v36, %v1776_v36 }
 0xe62   : > { %v1782_v39 = vsel %vm942_vm14, %v1778_v38, 0.0 }
 0xe63   : > { %1783 = vadd.xlane.f32.xlu0 %v1782_v39 }
 0xeec   : > { %v1781_v42 = vpop.xlane.xlu0 %1780 }
 0xeed   : > { %v1785_v43 = vmul.f32 0.03125, %v1781_v42 }
 0xeef   : > { %v1787_v44 = vadd.f32 1e-05, %v1785_v43 }
 0xef0   : > { %v1784_v45 = vpop.xlane.xlu0 %1783 }
 0xef1   : > { %3732 = vrsqrt.f32 %v1787_v44  ;;  %v1786_v46 = vmul.f32 0.03125, %v1784_v45 }
 0xef3   : > { %v1788_v47 = vadd.f32 1e-05, %v1786_v46 }
 0xef5   : > { %3734 = vrsqrt.f32 %v1788_v47 }
 0xefb   : > { %v3733_v49 = vpop.eup %3732 }
 0xefc   : > { %v1791_v50 = vmul.f32 %v3733_v49, %v1775_v48  ;;  %v3686_v49 = vld [vmem:[%s4474_s12 + $0x10] sm:$0xff]  }
 0xefe   : > { %v1799_v54 = vmul.f32 %v3266_v51, %v1791_v50  ;;  %v3687_v50 = vld [vmem:[%s4474_s12 + $0x18] sm:$0xff]  }
 0xeff   : > { %v3735_v53 = vpop.eup %3734 }
 0xf00   : > { %v1792_v55 = vmul.f32 %v3735_v53, %v1776_v36  ;;  %v1807_v59 = vadd.f32 %v3267_v56, %v1799_v54 }
 0xf02   : > { %v1800_v57 = vmul.f32 %v3266_v51, %v1792_v55 }
 0xf04   : > { %v1808_v60 = vadd.f32 %v3267_v56, %v1800_v57 }
 0xf06   : > { %v1813_v30 = vpack.c.bf16 %v1808_v60, %v1807_v59 }
 0xf08   : > { %3530 = vmatmul.mubr.msk.bf16.vlgmr.msra.gmra.mrb[32].mxu0 %vm938_vm13, %v1813_v30  ;;  %v3280_v30 = vld [vmem:[%s4472_s10 + $0x1] ss:$0 sm:$0xff] }
 0xf09   : > { %3549 = vmatprep.mubr.msk.bf16.mxu0 %vm3798_vm0, %v3797_v1  ;;  %3546 = vmatpush3.bf16.msra.mxu0 %v3686_v49 }
 0xf0a   : > { %3547 = vmatprep.subr.bf16.mxu0 %v3797_v1 }
 0xf0d   : > { %3548 = vmatpush3.bf16.msra.mxu0 %v3687_v50 }
 0xf0e   : > { %3553 = vmatprep.subr.bf16.mxu0 %v3797_v1 }
 0xfdb   : > { %v1870_v4 = vpop.f32.mrb[32].mxu0 }
 0xfdc   : > { %v1871_v5 = vadd.f32 %v3268_v3, %v1870_v4  ;;  %v3531_v6 = vpop.f32.mrb[33].mxu0 }
 0xfdd   : > { %v1873_v7 = vpop.f32.mrb[34].mxu0 }
 0xfde   : > { %v1877_v8 = vmul.f32 %v1871_v5, %v1871_v5  ;;  %v1874_v9 = vadd.f32 %v3268_v3, %v1873_v7  ;;  %v3532_v10 = vpop.f32.mrb[35].mxu0  ;;  %v3287_v7 = vld [vmem:[%s4475_s13 + $0x1] ss:$0 sm:$0xff] }
 0xfe0   : > { %v1879_v11 = vmul.f32 %v1877_v8, %v1871_v5  ;;  %v1878_v58 = vmul.f32 %v1874_v9, %v1874_v9 }
 0xfe2   : > { %v1881_v61 = vmul.f32 0.044715, %v1879_v11  ;;  %v1880_v12 = vmul.f32 %v1878_v58, %v1874_v9 }
 0xfe4   : > { %v1883_v13 = vadd.f32 %v1881_v61, %v1871_v5  ;;  %v1882_v14 = vmul.f32 0.044715, %v1880_v12 }
 0xfe6   : > { %v1885_v15 = vmul.f32 0.7978846, %v1883_v13  ;;  %v1884_v16 = vadd.f32 %v1882_v14, %v1874_v9 }
 0xfe8   : > { %3736 = vtanh.f32 %v1885_v15  ;;  %v1886_v17 = vmul.f32 0.7978846, %v1884_v16 }
 0xfea   : > { %3738 = vtanh.f32 %v1886_v17 }
 0xff2   : > { %v3737_v18 = vpop.eup %3736 }
 0xff3   : > { %v1889_v19 = vadd.f32 1.0, %v3737_v18 }
 0xff4   : > { %v3739_v20 = vpop.eup %3738 }
 0xff5   : > { %v1891_v21 = vmul.f32 0.5, %v1889_v19  ;;  %v1890_v22 = vadd.f32 1.0, %v3739_v20 }
 0xff7   : > { %v1892_v23 = vmul.f32 0.5, %v1890_v22  ;;  %v1893_v24 = vmul.f32 %v1891_v21, %v1871_v5 }
 0xff9   : > { %v1894_v26 = vmul.f32 %v1892_v23, %v1874_v9 }
 0xffb   : > { %v1903_v28 = vpack.c.bf16 %v1894_v26, %v1893_v24 }
 0xffd   : > { %3542 = vmatmul.mubr.msk.bf16.vlgmr.msra.gmra.mrb[32].mxu1 %vm1928_vm3, %v1903_v28 }
 0xffe   : > { %3561 = vmatprep.mubr.msk.bf16.mxu1 %vm3798_vm0, %v3797_v1 }
0x10d0   : > { %v1966_v31 = vpop.f32.mrb[32].mxu1 }
0x10d1   : > { %v1973_v32 = vadd.f32 %v1966_v31, %v4154_v25  ;;  %v3543_v48 = vpop.f32.mrb[33].mxu1 }
0x10d2   : > { %v1969_v33 = vpop.f32.mrb[34].mxu1 }
0x10d3   : > { %v4210_v34 = vadd.f32 %v3277_v29, %v1973_v32  ;;  %v1974_v35 = vadd.f32 %v1969_v33, %v4157_v27  ;;  %v3544_v36 = vpop.f32.mrb[35].mxu1 }
0x10d5   : > { %v4213_v52 = vadd.f32 %v3277_v29, %v1974_v35  ;;  %v1988_v38 = vsel %vm938_vm13, %v4210_v34, 0.0 }
0x10d6   : > { %1989 = vadd.xlane.f32.xlu1 %v1988_v38 }
0x10d7   : > { %v1991_v39 = vsel %vm942_vm14, %v4213_v52, 0.0 }
0x10d8   : > { %1992 = vadd.xlane.f32.xlu0 %v1991_v39 }
0x1163   : > { %v1990_v40 = vpop.xlane.xlu1 %1989 }
0x1164   : > { %v1994_v41 = vmul.f32 0.03125, %v1990_v40 }
0x1165   : > { %v1993_v25 = vpop.xlane.xlu0 %1992 }
0x1166   : > { %v1996_v42 = vsub.f32 %v4210_v34, %v1994_v41  ;;  %v1995_v43 = vmul.f32 0.03125, %v1993_v25 }
0x1168   : > { %v1997_v44 = vsub.f32 %v4213_v52, %v1995_v43  ;;  %v1998_v27 = vmul.f32 %v1996_v42, %v1996_v42 }
0x116a   : > { %v2000_v45 = vsel %vm938_vm13, %v1998_v27, 0.0  ;;  %v1999_v46 = vmul.f32 %v1997_v44, %v1997_v44 }
0x116b   : > { %2001 = vadd.xlane.f32.xlu0 %v2000_v45 }
0x116c   : > { %v2003_v47 = vsel %vm942_vm14, %v1999_v46, 0.0 }
0x116f   : > { %2004 = vadd.xlane.f32.xlu0 %v2003_v47 }
0x11f8   : > { %v2002_v51 = vpop.xlane.xlu0 %2001 }
0x11f9   : > { %v2006_v53 = vmul.f32 0.03125, %v2002_v51 }
0x11fb   : > { %v2008_v54 = vadd.f32 1e-05, %v2006_v53 }
0x11fc   : > { %v2005_v55 = vpop.xlane.xlu0 %2004 }
0x11fd   : > { %3740 = vrsqrt.f32 %v2008_v54  ;;  %v2007_v56 = vmul.f32 0.03125, %v2005_v55 }
0x11ff   : > { %v2009_v57 = vadd.f32 1e-05, %v2007_v56 }
0x1201   : > { %3742 = vrsqrt.f32 %v2009_v57 }
0x1207   : > { %v3741_v59 = vpop.eup %3740 }
0x1208   : > { %v2012_v60 = vmul.f32 %v3741_v59, %v1996_v42 }
0x120a   : > { %v2020_v63 = vmul.f32 %v3280_v30, %v2012_v60 }
0x120b   : > { %v3743_v62 = vpop.eup %3742 }
0x120c   : > { %v2013_v0 = vmul.f32 %v3743_v62, %v1997_v44  ;;  %v2028_v4 = vadd.f32 %v3281_v2, %v2020_v63 }
0x120e   : > { %v2021_v3 = vmul.f32 %v3280_v30, %v2013_v0 }
0x1210   : > { %v2029_v5 = vadd.f32 %v3281_v2, %v2021_v3 }
0x1212   : > { %v2035_v6 = vpack.c.bf16 %v2029_v5, %v2028_v4 }
0x1214   : > { %3550 = vmatmul.mubr.msk.bf16.vlgmr.msra.gmra.mrb[36].mxu0 %vm938_vm13, %v2035_v6 }
0x1215   : > { %3555 = vmatprep.mubr.msk.bf16.mxu0 %vm3798_vm0, %v3797_v1 }
0x12e7   : > { %v2093_v8 = vpop.f32.mrb[36].mxu0 }
0x12e8   : > { %v2094_v9 = vadd.f32 %v3287_v7, %v2093_v8  ;;  %v3551_v10 = vpop.f32.mrb[37].mxu0 }
0x12e9   : > { %v2096_v11 = vpop.f32.mrb[38].mxu0 }
0x12ea   : > { %v2097_v58 = vadd.f32 %v3287_v7, %v2096_v11  ;;  %v3552_v61 = vpop.f32.mrb[39].mxu0  ;;  %v2105_v12 = vmul.f32 0.35355338, %v2094_v9 }
0x12ec   : > { %v2106_v13 = vmul.f32 0.35355338, %v2097_v58  ;;  %v4243_v14 = vpack.c.bf16 %v2097_v58, %v2094_v9 }
0x12ee   : > { %v4245_v15 = vpack.c.bf16 %v2106_v13, %v2105_v12  ;;  %2110 = vrot.lane.b32.xlu0 %v4243_v14, %s3801_s1  ;;  %s4506_s1 = smov 112  }
0x12f0   : > { %2233 = vrot.lane.b32.xlu1 %v4245_v15, %s3802_s5 }
0x12f2   : > { %2235 = vrot.lane.b32.xlu0 %v4243_v14, %s3800_s23  ;;  %s4505_s23 = smov 80  }
0x1360   : > { %v2111_v16 = vpop.permute.xlu0 %2110 }
0x1361   : > { %v2116_v17 = vsel %vm872_vm11, %v2111_v16, 0  ;;  %v3291_v16 = vld [vmem:[%s4476_s14 + $0x10] sm:$0xf] }
0x1362   : > { %3554 = vmatpush3.bf16.xpose.msra.mxu0 %v2116_v17  ;;  %v2234_v20 = vpop.permute.xlu1 %2233  ;;  %v2408_v17 = vsel %vm876_vm6, %v3291_v16, 0 }
0x1363   : > { %3565 = vmatprep.subr.bf16.mxu0 %v3797_v1 }
0x1364   : > { %v2236_v18 = vpop.permute.xlu0 %2235 }
0x1365   : > { %v2241_v19 = vsel %vm872_vm11, %v2236_v18, 0  ;;  %v3292_v18 = vld [vmem:[%s4476_s14 + $0x14] sm:$0xf] }
0x1369   : > { %3556 = vmatmul.mubr.msk.bf16.vlgmr.msra.gmra.mrb[40].mxu0 %vm872_vm11, %v4245_v15 }
0x136a   : > { %3566 = vmatpush3.bf16.xpose.msra.mxu0 %v2241_v19  ;;  %3567 = vmatprep.mubr.msk.bf16.mxu0 %vm3798_vm0, %v3797_v1  ;;  %v2361_v19 = vsel %vm876_vm6, %v3292_v18, 0 }
0x136b   : > { %3577 = vmatprep.subr.bf16.mxu0 %v3797_v1 }
0x1371   : > { %3568 = vmatmul.mubr.msk.bf16.vlgmr.msra.gmra.mrb[44].mxu0 %vm872_vm11, %v2234_v20 }
0x1372   : > { %3579 = vmatprep.mubr.msk.bf16.mxu0 %vm3798_vm0, %v3797_v1  ;;  %3578 = vmatpush3.bf16.msra.mxu0 %v2361_v19 }
0x1373   : > { %3589 = vmatprep.subr.bf16.mxu0 %v3797_v1 }
0x143c   : > { %v2152_v21 = vpop.f32.mrb[40].mxu0 }
0x143d   : > { %v2153_v22 = vadd.f32 %v4040_v37, %v2152_v21  ;;  %v3557_v23 = vpop.f32.mrb[41].mxu0 }
0x143e   : > { %v2155_v24 = vpop.f32.mrb[42].mxu0 }
0x143f   : > { %v2156_v26 = vadd.f32 %v4040_v37, %v2155_v24  ;;  %v3558_v28 = vpop.f32.mrb[43].mxu0  ;;  %v2159_v31 = vsel %vm797_vm4, %v2153_v22, -inf }
0x1440   : > { %2160 = vmax.xlane.f32.xlu0 %v2159_v31 }
0x1441   : > { %v2162_v29 = vsel %vm1118_vm1, %v2156_v26, -inf }
0x1442   : > { %2163 = vmax.xlane.f32.xlu1 %v2162_v29 }
0x1444   : > { %v2277_v32 = vpop.f32.mrb[44].mxu0 }
0x1445   : > { %v2278_v48 = vadd.f32 %v4040_v37, %v2277_v32  ;;  %v3569_v33 = vpop.f32.mrb[45].mxu0 }
0x1446   : > { %v2280_v35 = vpop.f32.mrb[46].mxu0 }
0x1447   : > { %v2281_v36 = vadd.f32 %v4040_v37, %v2280_v35  ;;  %v3570_v38 = vpop.f32.mrb[47].mxu0  ;;  %v2284_v39 = vsel %vm797_vm4, %v2278_v48, -inf }
0x1448   : > { %2285 = vmax.xlane.f32.xlu0 %v2284_v39 }
0x1449   : > { %v2287_v40 = vsel %vm1118_vm1, %v2281_v36, -inf }
0x144c   : > { %2288 = vmax.xlane.f32.xlu0 %v2287_v40 }
0x14cd   : > { %v2161_v41 = vpop.xlane.xlu0 %2160 }
0x14ce   : > { %v2165_v25 = vsub.f32 %v2153_v22, %v2161_v41 }
0x14cf   : > { %v2164_v42 = vpop.xlane.xlu1 %2163 }
0x14d0   : > { %v2167_v43 = vmul.f32 1.442695, %v2165_v25  ;;  %v2166_v44 = vsub.f32 %v2156_v26, %v2164_v42 }
0x14d2   : > { %3744 = vpow2.f32 %v2167_v43  ;;  %v2169_v27 = vmul.f32 1.442695, %v2166_v44 }
0x14d4   : > { %3746 = vpow2.f32 %v2169_v27 }
0x14d5   : > { %v2286_v45 = vpop.xlane.xlu0 %2285 }
0x14d6   : > { %v2290_v46 = vsub.f32 %v2278_v48, %v2286_v45 }
0x14d8   : > { %v2292_v47 = vmul.f32 1.442695, %v2290_v46  ;;  %v4320_v46 = vld [vmem:[%s4037_s26] ss:$0 sm:$0xff]  ;;  %s4507_s26 = smov 72  }
0x14d9   : > { %v2289_v49 = vpop.xlane.xlu0 %2288 }
0x14da   : > { %3748 = vpow2.f32 %v2292_v47  ;;  %v2291_v37 = vsub.f32 %v2281_v36, %v2289_v49 }
0x14dc   : > { %v3745_v50 = vpop.eup %3744  ;;  %v2294_v51 = vmul.f32 1.442695, %v2291_v37 }
0x14dd   : > { %v2171_v53 = vsel %vm797_vm4, %v3745_v50, 0.0 }
0x14de   : > { %v3747_v54 = vpop.eup %3746  ;;  %3750 = vpow2.f32 %v2294_v51  ;;  %2172 = vadd.xlane.f32.xlu0 %v2171_v53 }
0x14df   : > { %v2174_v55 = vsel %vm1118_vm1, %v3747_v54, 0.0 }
0x14e2   : > { %2175 = vadd.xlane.f32.xlu0 %v2174_v55 }
0x14e4   : > { %v3749_v56 = vpop.eup %3748 }
0x14e5   : > { %v2296_v57 = vsel %vm797_vm4, %v3749_v56, 0.0 }
0x14e6   : > { %2297 = vadd.xlane.f32.xlu0 %v2296_v57 }
0x14e8   : > { %v3751_v59 = vpop.eup %3750 }
0x14e9   : > { %v2299_v60 = vsel %vm1118_vm1, %v3751_v59, 0.0 }
0x14ea   : > { %2300 = vadd.xlane.f32.xlu1 %v2299_v60 }
0x14fb   : > { %2307 = vrot.lane.b32.xlu1 %v4243_v14, %s3803_s28 }
0x14fc   : > { %2182 = vrot.lane.b32.xlu0 %v4243_v14, %s3804_s2 }
0x14ff   : > { %2453 = vrot.lane.b32.xlu1 %v4243_v14, %s4505_s23 }
0x1500   : > { %2451 = vrot.lane.b32.xlu0 %v4245_v15, %s4506_s1 }
0x156b   : > { %v2173_v30 = vpop.xlane.xlu0 %2172 }
0x156c   : > { %3752 = vrcp.f32 %v2173_v30 }
0x156f   : > { %v2176_v62 = vpop.xlane.xlu0 %2175 }
0x1570   : > { %3754 = vrcp.f32 %v2176_v62 }
0x1573   : > { %v2298_v63 = vpop.xlane.xlu0 %2297 }
0x1574   : > { %3756 = vrcp.f32 %v2298_v63 }
0x1576   : > { %v3753_v3 = vpop.eup %3752 }
0x1577   : > { %v2301_v0 = vpop.xlane.xlu1 %2300  ;;  %v2183_v2 = vpop.permute.xlu0 %2182  ;;  %v2179_v6 = vmul.f32 %v3753_v3, %v3745_v50 }
0x1578   : > { %3758 = vrcp.f32 %v2301_v0  ;;  %v2188_v4 = vsel %vm801_vm2, %v2183_v2, 0 }
0x1579   : > { %3560 = vmatpush3.bf16.msra.mxu1 %v2188_v4 }
0x157a   : > { %v3755_v5 = vpop.eup %3754  ;;  %3571 = vmatprep.subr.bf16.mxu1 %v3797_v1 }
0x157b   : > { %v2180_v7 = vmul.f32 %v3755_v5, %v3747_v54  ;;  %v2308_v8 = vpop.permute.xlu1 %2307  ;;  %v2452_v35 = vpop.permute.xlu0 %2451 }
0x157c   : > { %v2313_v10 = vsel %vm801_vm2, %v2308_v8, 0 }
0x157d   : > { %v2181_v9 = vpack.c.bf16 %v2180_v7, %v2179_v6 }
0x157e   : > { %v3757_v11 = vpop.eup %3756 }
0x157f   : > { %3562 = vmatmul.mubr.msk.bf16.vlgmr.msra.gmra.mrb[36].mxu1 %vm797_vm4, %v2181_v9  ;;  %v2304_v61 = vmul.f32 %v3757_v11, %v3749_v56  ;;  %v2454_v31 = vpop.permute.xlu1 %2453 }
0x1580   : > { %3572 = vmatpush3.bf16.msra.mxu1 %v2313_v10  ;;  %3573 = vmatprep.mubr.msk.bf16.mxu1 %vm3798_vm0, %v3797_v1  ;;  %v2459_v33 = vsel %vm872_vm11, %v2454_v31, 0 }
0x1581   : > { %3583 = vmatprep.subr.bf16.mxu1 %v3797_v1 }
0x1582   : > { %v3759_v58 = vpop.eup %3758 }
0x1583   : > { %v2305_v12 = vmul.f32 %v3759_v58, %v3751_v59 }
0x1585   : > { %v2306_v13 = vpack.c.bf16 %v2305_v12, %v2304_v61  ;;  %v3293_v12 = vld [vmem:[%s4476_s14 + $0x18] sm:$0xf] }
0x1587   : > { %3574 = vmatmul.mubr.msk.bf16.vlgmr.msra.gmra.mrb[40].mxu1 %vm797_vm4, %v2306_v13  ;;  %v2579_v13 = vsel %vm876_vm6, %v3293_v12, 0 }
0x1588   : > { %3585 = vmatprep.mubr.msk.bf16.mxu1 %vm3798_vm0, %v3797_v1  ;;  %3584 = vmatpush3.bf16.msra.mxu1 %v2408_v17 }
0x1589   : > { %3595 = vmatprep.subr.bf16.mxu1 %v3797_v1 }
0x1652   : > { %v2224_v20 = vpop.f32.mrb[36].mxu1 }
0x1653   : > { %v3563_v21 = vpop.f32.mrb[37].mxu1 }
0x1654   : > { %v2227_v22 = vpop.f32.mrb[38].mxu1 }
0x1655   : > { %v2231_v23 = vpack.c.bf16 %v2227_v22, %v2224_v20  ;;  %v3564_v24 = vpop.f32.mrb[39].mxu1 }
0x1657   : > { %3586 = vmatmul.mubr.msk.bf16.vlgmr.msra.gmra.mrb[44].mxu1 %vm872_vm11, %v2231_v23 }
0x1658   : > { %3597 = vmatprep.mubr.msk.bf16.mxu1 %vm3798_vm0, %v3797_v1 }
0x165a   : > { %v2349_v26 = vpop.f32.mrb[40].mxu1 }
0x165b   : > { %v3575_v28 = vpop.f32.mrb[41].mxu1 }
0x165c   : > { %v2352_v29 = vpop.f32.mrb[42].mxu1 }
0x165d   : > { %v2356_v32 = vpack.c.bf16 %v2352_v29, %v2349_v26  ;;  %v3576_v48 = vpop.f32.mrb[43].mxu1 }
0x165f   : > { %3580 = vmatmul.mubr.msk.bf16.vlgmr.msra.gmra.mrb[48].mxu0 %vm872_vm11, %v2356_v32 }
0x1660   : > { %3590 = vmatpush3.bf16.xpose.msra.mxu0 %v2459_v33  ;;  %3591 = vmatprep.mubr.msk.bf16.mxu0 %vm3798_vm0, %v3797_v1 }
0x1661   : > { %3601 = vmatprep.subr.bf16.mxu0 %v3797_v1 }
0x1667   : > { %3592 = vmatmul.mubr.msk.bf16.vlgmr.msra.gmra.mrb[52].mxu0 %vm872_vm11, %v2452_v35 }
0x1668   : > { %3603 = vmatprep.mubr.msk.bf16.mxu0 %vm3798_vm0, %v3797_v1  ;;  %3602 = vmatpush3.bf16.msra.mxu0 %v2579_v13 }
0x1669   : > { %3613 = vmatprep.subr.bf16.mxu0 %v3797_v1 }
0x172a   : > { %v2444_v36 = vpop.f32.mrb[44].mxu1 }
0x172b   : > { %v3587_v38 = vpop.f32.mrb[45].mxu1 }
0x172c   : > { %v2447_v39 = vpop.f32.mrb[46].mxu1 }
0x172d   : > { %v3588_v40 = vpop.f32.mrb[47].mxu1 }
0x1732   : > { %v2397_v41 = vpop.f32.mrb[48].mxu0 }
0x1733   : > { %v4315_v25 = vadd.f32 %v2444_v36, %v2397_v41  ;;  %v3581_v42 = vpop.f32.mrb[49].mxu0 }
0x1734   : > { %v2400_v43 = vpop.f32.mrb[50].mxu0 }
0x1735   : > { %v4317_v44 = vadd.f32 %v2447_v39, %v2400_v43  ;;  %v3582_v27 = vpop.f32.mrb[51].mxu0 }
0x173a   : > { %v2495_v45 = vpop.f32.mrb[52].mxu0 }
0x173b   : > { %v2496_v47 = vadd.f32 %v4320_v46, %v2495_v45  ;;  %v3593_v49 = vpop.f32.mrb[53].mxu0 }
0x173c   : > { %v2498_v37 = vpop.f32.mrb[54].mxu0 }
0x173d   : > { %v2499_v50 = vadd.f32 %v4320_v46, %v2498_v37  ;;  %v3594_v51 = vpop.f32.mrb[55].mxu0  ;;  %v2502_v53 = vsel %vm797_vm4, %v2496_v47, -inf }
0x173e   : > { %2503 = vmax.xlane.f32.xlu1 %v2502_v53 }
0x173f   : > { %v2505_v54 = vsel %vm1118_vm1, %v2499_v50, -inf }
0x1740   : > { %2506 = vmax.xlane.f32.xlu0 %v2505_v54 }
0x17cb   : > { %v2504_v55 = vpop.xlane.xlu1 %2503 }
0x17cc   : > { %v2508_v56 = vsub.f32 %v2496_v47, %v2504_v55 }
0x17cd   : > { %v2507_v57 = vpop.xlane.xlu0 %2506 }
0x17ce   : > { %v2510_v59 = vmul.f32 1.442695, %v2508_v56  ;;  %v2509_v60 = vsub.f32 %v2499_v50, %v2507_v57 }
0x17d0   : > { %3760 = vpow2.f32 %v2510_v59  ;;  %v2512_v30 = vmul.f32 1.442695, %v2509_v60 }
0x17d2   : > { %3762 = vpow2.f32 %v2512_v30 }
0x17da   : > { %v3761_v62 = vpop.eup %3760 }
0x17db   : > { %v2514_v63 = vsel %vm797_vm4, %v3761_v62, 0.0 }
0x17dc   : > { %v3763_v0 = vpop.eup %3762  ;;  %2515 = vadd.xlane.f32.xlu0 %v2514_v63 }
0x17dd   : > { %v2517_v2 = vsel %vm1118_vm1, %v3763_v0, 0.0 }
0x17de   : > { %2518 = vadd.xlane.f32.xlu1 %v2517_v2 }
0x17ef   : > { %2626 = vrot.lane.b32.xlu1 %v4243_v14, %s4507_s26 }
0x17f2   : > { %2525 = vrot.lane.b32.xlu0 %v4243_v14, %s4508_s24 }
0x17f3   : > { %2624 = vrot.lane.b32.xlu1 %v4245_v15, %s4509_s27 }
0x1869   : > { %v2516_v3 = vpop.xlane.xlu0 %2515 }
0x186a   : > { %3764 = vrcp.f32 %v2516_v3 }
0x186b   : > { %v2519_v4 = vpop.xlane.xlu1 %2518 }
0x186c   : > { %3766 = vrcp.f32 %v2519_v4  ;;  %v3308_v4 = vld [vmem:[%s4477_s15 + $0x1] ss:$0 sm:$0xff] }
0x186d   : > { %v2526_v5 = vpop.permute.xlu0 %2525 }
0x186e   : > { %v2531_v6 = vsel %vm801_vm2, %v2526_v5, 0 }
0x186f   : > { %3596 = vmatpush3.bf16.msra.mxu1 %v2531_v6  ;;  %v2627_v11 = vpop.permute.xlu1 %2626 }
0x1870   : > { %3607 = vmatprep.subr.bf16.mxu1 %v3797_v1  ;;  %v2632_v61 = vsel %vm872_vm11, %v2627_v11, 0 }
0x1873   : > { %v2625_v15 = vpop.permute.xlu1 %2624 }
0x1874   : > { %v3765_v7 = vpop.eup %3764 }
0x1875   : > { %v2522_v9 = vmul.f32 %v3765_v7, %v3761_v62 }
0x1876   : > { %v3767_v8 = vpop.eup %3766 }
0x1877   : > { %v2523_v10 = vmul.f32 %v3767_v8, %v3763_v0 }
0x1879   : > { %v2524_v58 = vpack.c.bf16 %v2523_v10, %v2522_v9 }
0x187b   : > { %3598 = vmatmul.mubr.msk.bf16.vlgmr.msra.gmra.mrb[48].mxu1 %vm797_vm4, %v2524_v58 }
0x187c   : > { %3608 = vmatpush3.bf16.xpose.msra.mxu1 %v2632_v61  ;;  %3609 = vmatprep.mubr.msk.bf16.mxu1 %vm3798_vm0, %v3797_v1 }
0x187d   : > { %3619 = vmatprep.subr.bf16.mxu1 %v3797_v1 }
0x1883   : > { %3610 = vmatmul.mubr.msk.bf16.vlgmr.msra.gmra.mrb[52].mxu1 %vm872_vm11, %v2625_v15 }
0x1884   : > { %3621 = vmatprep.mubr.msk.bf16.mxu1 %vm3798_vm0, %v3797_v1 }
0x194e   : > { %v2567_v16 = vpop.f32.mrb[48].mxu1 }
0x194f   : > { %v3599_v17 = vpop.f32.mrb[49].mxu1 }
0x1950   : > { %v2570_v18 = vpop.f32.mrb[50].mxu1 }
0x1951   : > { %v2574_v19 = vpack.c.bf16 %v2570_v18, %v2567_v16  ;;  %v3600_v20 = vpop.f32.mrb[51].mxu1 }
0x1953   : > { %3604 = vmatmul.mubr.msk.bf16.vlgmr.msra.gmra.mrb[56].mxu0 %vm872_vm11, %v2574_v19 }
0x1954   : > { %3615 = vmatprep.mubr.msk.bf16.mxu0 %vm3798_vm0, %v3797_v1 }
0x1956   : > { %v2668_v21 = vpop.f32.mrb[52].mxu1 }
0x1957   : > { %v2669_v22 = vadd.f32 %v4320_v46, %v2668_v21  ;;  %v3611_v23 = vpop.f32.mrb[53].mxu1  ;;  %v3688_v21 = vld [vmem:[%s4480_s18 + $0x10] sm:$0xff]  }
0x1958   : > { %v2671_v24 = vpop.f32.mrb[54].mxu1 }
0x1959   : > { %v2672_v26 = vadd.f32 %v4320_v46, %v2671_v24  ;;  %v3612_v28 = vpop.f32.mrb[55].mxu1  ;;  %v2675_v31 = vsel %vm797_vm4, %v2669_v22, -inf }
0x195a   : > { %2676 = vmax.xlane.f32.xlu0 %v2675_v31 }
0x195b   : > { %v2678_v29 = vsel %vm1118_vm1, %v2672_v26, -inf }
0x195c   : > { %2679 = vmax.xlane.f32.xlu1 %v2678_v29 }
0x196d   : > { %2698 = vrot.lane.b32.xlu1 %v4243_v14, %s4510_s0 }
0x19e7   : > { %v2677_v32 = vpop.xlane.xlu0 %2676 }
0x19e8   : > { %v2681_v48 = vsub.f32 %v2669_v22, %v2677_v32  ;;  %v3689_v22 = vld [vmem:[%s4480_s18 + $0x18] sm:$0xff]  }
0x19e9   : > { %v2680_v33 = vpop.xlane.xlu1 %2679 }
0x19ea   : > { %v2683_v35 = vmul.f32 1.442695, %v2681_v48  ;;  %v2682_v36 = vsub.f32 %v2672_v26, %v2680_v33  ;;  %v3311_v33 = vld [vmem:[%s4478_s16 + $0x1] ss:$0 sm:$0xff] }
0x19ec   : > { %3768 = vpow2.f32 %v2683_v35  ;;  %v2685_v38 = vmul.f32 1.442695, %v2682_v36 }
0x19ed   : > { %v2699_v39 = vpop.permute.xlu1 %2698 }
0x19ee   : > { %3770 = vpow2.f32 %v2685_v38  ;;  %v2704_v40 = vsel %vm801_vm2, %v2699_v39, 0  ;;  %v3312_v39 = vld [vmem:[%s4479_s17 + $0x1] ss:$0 sm:$0xff] }
0x19ef   : > { %3614 = vmatpush3.bf16.msra.mxu0 %v2704_v40 }
0x19f0   : > { %3625 = vmatprep.subr.bf16.mxu0 %v3797_v1 }
0x19f6   : > { %v3769_v41 = vpop.eup %3768 }
0x19f7   : > { %v2687_v42 = vsel %vm797_vm4, %v3769_v41, 0.0 }
0x19f8   : > { %v3771_v43 = vpop.eup %3770  ;;  %2688 = vadd.xlane.f32.xlu0 %v2687_v42 }
0x19f9   : > { %v2690_v14 = vsel %vm1118_vm1, %v3771_v43, 0.0 }
0x19fc   : > { %2691 = vadd.xlane.f32.xlu0 %v2690_v14  ;;  %v3690_v14 = vld [vmem:[%s4482_s20 + $0x20] sm:$0xff]  }
0x1a26   : > { %v2615_v27 = vpop.f32.mrb[56].mxu0 }
0x1a27   : > { %v2622_v45 = vadd.f32 %v2615_v27, %v4315_v25  ;;  %v3605_v46 = vpop.f32.mrb[57].mxu0  ;;  %v3294_v25 = vld [vmem:[%s4476_s14 + $0x1c] sm:$0xf]  ;;  %v3691_v27 = vld [vmem:[%s4482_s20 + $0x28] sm:$0xff]  }
0x1a28   : > { %v2618_v47 = vpop.f32.mrb[58].mxu0  ;;  %v3693_v46 = vld [vmem:[%s4482_s20 + $0x38] sm:$0xff]  }
0x1a29   : > { %v2623_v49 = vadd.f32 %v2618_v47, %v4317_v44  ;;  %v3606_v37 = vpop.f32.mrb[59].mxu0  ;;  %v2752_v44 = vsel %vm876_vm6, %v3294_v25, 0  ;;  %v3318_v47 = vld [vmem:[%s4481_s19 + $0x1] ss:$0 sm:$0xff] }
0x1a2a   : > { %3620 = vmatpush3.bf16.msra.mxu1 %v2752_v44 }
0x1a2b   : > { %3633 = vmatprep.subr.bf16.mxu1 %v3797_v1 }
0x1a85   : > { %v2689_v50 = vpop.xlane.xlu0 %2688 }
0x1a86   : > { %3772 = vrcp.f32 %v2689_v50 }
0x1a89   : > { %v2692_v51 = vpop.xlane.xlu0 %2691 }
0x1a8a   : > { %3774 = vrcp.f32 %v2692_v51 }
0x1a90   : > { %v3773_v53 = vpop.eup %3772 }
0x1a91   : > { %v2695_v55 = vmul.f32 %v3773_v53, %v3769_v41 }
0x1a94   : > { %v3775_v54 = vpop.eup %3774 }
0x1a95   : > { %v2696_v56 = vmul.f32 %v3775_v54, %v3771_v43 }
0x1a97   : > { %v2697_v57 = vpack.c.bf16 %v2696_v56, %v2695_v55 }
0x1a99   : > { %3616 = vmatmul.mubr.msk.bf16.vlgmr.msra.gmra.mrb[60].mxu0 %vm797_vm4, %v2697_v57 }
0x1a9a   : > { %3629 = vmatprep.mubr.msk.bf16.mxu0 %vm3798_vm0, %v3797_v1  ;;  %3626 = vmatpush3.bf16.msra.mxu0 %v3688_v21 }
0x1a9b   : > { %3627 = vmatprep.subr.bf16.mxu0 %v3797_v1 }
0x1a9e   : > { %3628 = vmatpush3.bf16.msra.mxu0 %v3689_v22 }
0x1a9f   : > { %3645 = vmatprep.subr.bf16.mxu0 %v3797_v1 }
0x1b6c   : > { %v2740_v59 = vpop.f32.mrb[60].mxu0 }
0x1b6d   : > { %v3617_v60 = vpop.f32.mrb[61].mxu0 }
0x1b6e   : > { %v2743_v30 = vpop.f32.mrb[62].mxu0 }
0x1b6f   : > { %v2747_v62 = vpack.c.bf16 %v2743_v30, %v2740_v59  ;;  %v3618_v63 = vpop.f32.mrb[63].mxu0 }
0x1b71   : > { %3622 = vmatmul.mubr.msk.bf16.vlgmr.msra.gmra.mrb[56].mxu1 %vm872_vm11, %v2747_v62 }
0x1b72   : > { %3641 = vmatprep.mubr.msk.bf16.mxu1 %vm3798_vm0, %v3797_v1  ;;  %3634 = vmatpush3.bf16.msra.mxu1 %v3690_v14 }
0x1b73   : > { %3635 = vmatprep.subr.bf16.mxu1 %v3797_v1 }
0x1b76   : > { %3636 = vmatpush3.bf16.msra.mxu1 %v3691_v27 }
0x1b77   : > { %3637 = vmatprep.subr.bf16.mxu1 %v3797_v1 }
0x1c44   : > { %v2788_v0 = vpop.f32.mrb[56].mxu1 }
0x1c45   : > { %v2795_v2 = vadd.f32 %v2788_v0, %v2622_v45  ;;  %v3623_v3 = vpop.f32.mrb[57].mxu1  ;;  %v3692_v45 = vld [vmem:[%s4482_s20 + $0x30] sm:$0xff]  }
0x1c46   : > { %v2791_v5 = vpop.f32.mrb[58].mxu1  ;;  %3638 = vmatpush3.bf16.msra.mxu1 %v3692_v45 }
0x1c47   : > { %v2797_v6 = vadd.f32 %v2795_v2, %v4210_v34  ;;  %v2796_v7 = vadd.f32 %v2791_v5, %v2623_v49  ;;  %v3624_v8 = vpop.f32.mrb[59].mxu1  ;;  %3639 = vmatprep.subr.bf16.mxu1 %v3797_v1 }
0x1c49   : > { %v4379_v9 = vadd.f32 %v3308_v4, %v2797_v6  ;;  %v2798_v10 = vadd.f32 %v2796_v7, %v4213_v52 }
0x1c4a   : > { %3640 = vmatpush3.bf16.msra.mxu1 %v3693_v46 }
0x1c4b   : > { %v4382_v11 = vadd.f32 %v3308_v4, %v2798_v10  ;;  %v2813_v58 = vsel %vm938_vm13, %v4379_v9, 0.0 }
0x1c4c   : > { %2814 = vadd.xlane.f32.xlu0 %v2813_v58 }
0x1c4d   : > { %v2816_v61 = vsel %vm942_vm14, %v4382_v11, 0.0 }
0x1c50   : > { %2817 = vadd.xlane.f32.xlu0 %v2816_v61  ;;  %v3336_v61 = vld [vmem:[%s4483_s21 + $0x1] ss:$0 sm:$0xff] }
0x1cd9   : > { %v2815_v15 = vpop.xlane.xlu0 %2814 }
0x1cda   : > { %v2819_v12 = vmul.f32 0.03125, %v2815_v15 }
0x1cdc   : > { %v2821_v34 = vsub.f32 %v4379_v9, %v2819_v12 }
0x1cdd   : > { %v2818_v13 = vpop.xlane.xlu0 %2817 }
0x1cde   : > { %v2820_v16 = vmul.f32 0.03125, %v2818_v13  ;;  %v2823_v17 = vmul.f32 %v2821_v34, %v2821_v34 }
0x1ce0   : > { %v2822_v18 = vsub.f32 %v4382_v11, %v2820_v16  ;;  %v2825_v52 = vsel %vm938_vm13, %v2823_v17, 0.0 }
0x1ce1   : > { %2826 = vadd.xlane.f32.xlu0 %v2825_v52 }
0x1ce2   : > { %v2824_v19 = vmul.f32 %v2822_v18, %v2822_v18 }
0x1ce4   : > { %v2828_v20 = vsel %vm942_vm14, %v2824_v19, 0.0 }
0x1ce5   : > { %2829 = vadd.xlane.f32.xlu0 %v2828_v20 }
0x1d6e   : > { %v2827_v23 = vpop.xlane.xlu0 %2826 }
0x1d6f   : > { %v2831_v24 = vmul.f32 0.03125, %v2827_v23 }
0x1d71   : > { %v2833_v26 = vadd.f32 1e-05, %v2831_v24 }
0x1d72   : > { %v2830_v28 = vpop.xlane.xlu0 %2829 }
0x1d73   : > { %3776 = vrsqrt.f32 %v2833_v26  ;;  %v2832_v31 = vmul.f32 0.03125, %v2830_v28 }
0x1d75   : > { %v2834_v29 = vadd.f32 1e-05, %v2832_v31 }
0x1d77   : > { %3778 = vrsqrt.f32 %v2834_v29  ;;  %v3694_v29 = vld [vmem:[%s4511_s30] sm:$0xff]  }
0x1d7d   : > { %v3777_v32 = vpop.eup %3776 }
0x1d7e   : > { %v2837_v48 = vmul.f32 %v3777_v32, %v2821_v34  ;;  %v3695_v32 = vld [vmem:[%s4511_s30 + $0x8] sm:$0xff]  }
0x1d80   : > { %v2845_v36 = vmul.f32 %v3311_v33, %v2837_v48 }
0x1d81   : > { %v3779_v35 = vpop.eup %3778 }
0x1d82   : > { %v2838_v38 = vmul.f32 %v3779_v35, %v2822_v18  ;;  %v2853_v41 = vadd.f32 %v3312_v39, %v2845_v36 }
0x1d84   : > { %v2846_v40 = vmul.f32 %v3311_v33, %v2838_v38 }
0x1d86   : > { %v2854_v42 = vadd.f32 %v3312_v39, %v2846_v40 }
0x1d88   : > { %v2860_v43 = vpack.c.bf16 %v2854_v42, %v2853_v41  ;;  %v3337_v42 = vld [vmem:[%s4470_s8] ss:$0 sm:$0xff] }
0x1d8a   : > { %3630 = vmatmul.mubr.msk.bf16.vlgmr.msra.gmra.mrb[64].mxu0 %vm938_vm13, %v2860_v43 }
0x1d8b   : > { %3649 = vmatprep.mubr.msk.bf16.mxu0 %vm3798_vm0, %v3797_v1  ;;  %3646 = vmatpush3.bf16.msra.mxu0 %v3694_v29  ;;  %vm3146_vm0 = vcmask 123904  }
0x1d8c   : > { %3647 = vmatprep.subr.bf16.mxu0 %v3797_v1  ;;  %v3338_v1 = vld [vmem:[%s4471_s9] ss:$0 sm:$0xff] }
0x1d8f   : > { %3648 = vmatpush3.bf16.msra.mxu0 %v3695_v32 }
0x1e5d   : > { %v2918_v49 = vpop.f32.mrb[64].mxu0 }
0x1e5e   : > { %v2919_v37 = vadd.f32 %v3318_v47, %v2918_v49  ;;  %v3631_v50 = vpop.f32.mrb[65].mxu0 }
0x1e5f   : > { %v2921_v51 = vpop.f32.mrb[66].mxu0 }
0x1e60   : > { %v2925_v53 = vmul.f32 %v2919_v37, %v2919_v37  ;;  %v2922_v54 = vadd.f32 %v3318_v47, %v2921_v51  ;;  %v3632_v55 = vpop.f32.mrb[67].mxu0 }
0x1e62   : > { %v2927_v56 = vmul.f32 %v2925_v53, %v2919_v37  ;;  %v2926_v57 = vmul.f32 %v2922_v54, %v2922_v54 }
0x1e64   : > { %v2929_v25 = vmul.f32 0.044715, %v2927_v56  ;;  %v2928_v44 = vmul.f32 %v2926_v57, %v2922_v54 }
0x1e66   : > { %v2931_v59 = vadd.f32 %v2929_v25, %v2919_v37  ;;  %v2930_v60 = vmul.f32 0.044715, %v2928_v44 }
0x1e68   : > { %v2933_v30 = vmul.f32 0.7978846, %v2931_v59  ;;  %v2932_v62 = vadd.f32 %v2930_v60, %v2922_v54 }
0x1e6a   : > { %3780 = vtanh.f32 %v2933_v30  ;;  %v2934_v63 = vmul.f32 0.7978846, %v2932_v62 }
0x1e6c   : > { %3782 = vtanh.f32 %v2934_v63 }
0x1e74   : > { %v3781_v0 = vpop.eup %3780 }
0x1e75   : > { %v2937_v2 = vadd.f32 1.0, %v3781_v0 }
0x1e76   : > { %v3783_v3 = vpop.eup %3782 }
0x1e77   : > { %v2939_v4 = vmul.f32 0.5, %v2937_v2  ;;  %v2938_v5 = vadd.f32 1.0, %v3783_v3 }
0x1e79   : > { %v2940_v6 = vmul.f32 0.5, %v2938_v5  ;;  %v2941_v7 = vmul.f32 %v2939_v4, %v2919_v37  ;;  %v3339_v37 = vld [vmem:[%s4469_s7] ss:$0 sm:$0xff] }
0x1e7b   : > { %v2942_v8 = vmul.f32 %v2940_v6, %v2922_v54 }
0x1e7d   : > { %v2952_v10 = vpack.c.bf16 %v2942_v8, %v2941_v7 }
0x1e7f   : > { %3642 = vmatmul.mubr.msk.bf16.vlgmr.msra.gmra.mrb[60].mxu1 %vm1928_vm3, %v2952_v10 }
0x1f52   : > { %v3014_v58 = vpop.f32.mrb[60].mxu1 }
0x1f53   : > { %v3021_v15 = vadd.f32 %v3014_v58, %v4379_v9  ;;  %v3643_v12 = vpop.f32.mrb[61].mxu1 }
0x1f54   : > { %v3017_v34 = vpop.f32.mrb[62].mxu1 }
0x1f55   : > { %v3022_v13 = vadd.f32 %v3017_v34, %v4382_v11  ;;  %v3644_v16 = vpop.f32.mrb[63].mxu1  ;;  %v3031_v17 = vadd.f32 %v3336_v61, %v3021_v15 }
0x1f57   : > { %v3035_v18 = vsel %vm938_vm13, %v3031_v17, 0.0  ;;  %v3032_v52 = vadd.f32 %v3336_v61, %v3022_v13 }
0x1f58   : > { %3036 = vadd.xlane.f32.xlu1 %v3035_v18 }
0x1f59   : > { %v3038_v19 = vsel %vm942_vm14, %v3032_v52, 0.0 }
0x1f5a   : > { %3039 = vadd.xlane.f32.xlu0 %v3038_v19 }
0x1fe5   : > { %v3037_v20 = vpop.xlane.xlu1 %3036 }
0x1fe6   : > { %v3041_v21 = vmul.f32 0.03125, %v3037_v20 }
0x1fe7   : > { %v3040_v22 = vpop.xlane.xlu0 %3039 }
0x1fe8   : > { %v3043_v23 = vsub.f32 %v3031_v17, %v3041_v21  ;;  %v3042_v24 = vmul.f32 0.03125, %v3040_v22 }
0x1fea   : > { %v3044_v26 = vsub.f32 %v3032_v52, %v3042_v24  ;;  %v3045_v9 = vmul.f32 %v3043_v23, %v3043_v23 }
0x1fec   : > { %v3047_v28 = vsel %vm938_vm13, %v3045_v9, 0.0  ;;  %v3046_v31 = vmul.f32 %v3044_v26, %v3044_v26 }
0x1fed   : > { %3048 = vadd.xlane.f32.xlu0 %v3047_v28 }
0x1fee   : > { %v3050_v11 = vsel %vm942_vm14, %v3046_v31, 0.0 }
0x1ff1   : > { %3051 = vadd.xlane.f32.xlu0 %v3050_v11 }
0x207a   : > { %v3049_v48 = vpop.xlane.xlu0 %3048 }
0x207b   : > { %v3053_v33 = vmul.f32 0.03125, %v3049_v48 }
0x207d   : > { %v3055_v35 = vadd.f32 1e-05, %v3053_v33 }
0x207e   : > { %v3052_v36 = vpop.xlane.xlu0 %3051 }
0x207f   : > { %3784 = vrsqrt.f32 %v3055_v35  ;;  %v3054_v38 = vmul.f32 0.03125, %v3052_v36 }
0x2081   : > { %v3056_v39 = vadd.f32 1e-05, %v3054_v38 }
0x2083   : > { %3786 = vrsqrt.f32 %v3056_v39 }
0x2089   : > { %v3785_v40 = vpop.eup %3784 }
0x208a   : > { %v3059_v41 = vmul.f32 %v3785_v40, %v3043_v23 }
0x208c   : > { %v3067_v14 = vmul.f32 %v3337_v42, %v3059_v41 }
0x208d   : > { %v3787_v43 = vpop.eup %3786 }
0x208e   : > { %v3060_v27 = vmul.f32 %v3787_v43, %v3044_v26  ;;  %v3075_v46 = vadd.f32 %v3338_v1, %v3067_v14 }
0x2090   : > { %v3068_v45 = vmul.f32 %v3337_v42, %v3060_v27 }
0x2092   : > { %v3076_v47 = vadd.f32 %v3338_v1, %v3068_v45 }
0x2094   : > { %v3081_v49 = vpack.c.bf16 %v3076_v47, %v3075_v46 }
0x2096   : > { %3650 = vmatmul.mubr.msk.bf16.vlgmr.msra.gmra.mrb[68].mxu0 %vm938_vm13, %v3081_v49 }
0x2169   : > { %v3138_v50 = vpop.f32.mrb[68].mxu0 }
0x216a   : > { %v3139_v51 = vadd.f32 %v3339_v37, %v3138_v50  ;;  %v3651_v53 = vpop.f32.mrb[69].mxu0 }
0x216b   : > { %v3141_v54 = vpop.f32.mrb[70].mxu0 }
0x216c   : > { %3145 = vst.msk [vmem:[%s717_s4] sm:$0xff] %vm737_vm5, %v3139_v51  ;;  %v3142_v55 = vadd.f32 %v3339_v37, %v3141_v54  ;;  %v3652_v56 = vpop.f32.mrb[71].mxu0 }
0x216e   : > { %3147 = vst.msk [vmem:[%s717_s4 + $0x8] sm:$0x3] %vm3146_vm0, %v3142_v55 }
0x216f PF: > { %s32_s3 = sadd.s32 1, %s3795_s3  }
0x2170   : > { %p29_p4 = scmp.ge.s32.totalorder %s32_s3, 4  }
0x2172   :  { %31 = sbr.rel (!%p29_p4) target bundleno = 8 (0x8), region = 156 }

</bundles_post_ra>
